<compile_context>
chip_gen: v6e
topology: v6e:2x2x1
jax: 0.10.0
libtpu: 0.0.40
codegen_flags: <defaults>
</compile_context>

<pallas_src>
import jax
import jax.numpy as jnp
from jax.experimental import pallas as pl
from jax.experimental.pallas import tpu as pltpu

# ----------------------------------------------------------------------------
# model constants (scaled stand-ins)
# ----------------------------------------------------------------------------
BIT = 16
NUM_CLASSES = 21
FEAT_DIM = 128       # stand-in for 4096
MID = 128            # stand-in for 1024*8
CIN_PAD = 8          # conv1 input channels zero-padded 3 -> 8 (zero weights: identical math)
_H = 16              # input spatial size
LANES = 128
X_K = _H * 9 * CIN_PAD          # 1152 = 9*128 lanes per conv1-LHS row


# ----------------------------------------------------------------------------
# fused kernel: one grid step == P images
# ----------------------------------------------------------------------------
def _make_kernel(P):
    R2 = 8 * P          # rows after pool1 (= conv2 M)
    R3 = 4 * P          # rows after pool2

    def kernel(x_ref, cw1_ref, cw2_ref, wf1_ref, wstk_ref, b_ref, code_ref, pred_ref):
        f32 = jnp.float32
        bf16 = jnp.bfloat16

        # ---- conv1 (+ folded BN) + ReLU: one matmul for all P images; the block-diagonal
        #      weight performs im2col x W and packs the output lane-dense as (H, W*C) ----
        h1 = jnp.dot(x_ref[...], cw1_ref[...], preferred_element_type=f32)   # (16P, 128)
        h1 = jnp.maximum(h1 + b_ref[0:1, :], 0.0)         # rows = 16*img + h, lanes = 8w+c

        # ---- maxpool 2x2 (in vregs): H via even/odd row pairs, W via an 8-lane shift.
        #      Odd-W lanes become don't-cares; conv2's zero weight rows ignore them. ------
        hp = h1.reshape(R2, 2, LANES)
        th = jnp.maximum(hp[:, 0, :], hp[:, 1, :])                            # (8P, 128)
        tws = jnp.concatenate([th[:, 8:], jnp.zeros((R2, 8), f32)], axis=1)
        p1 = jnp.maximum(th, tws)                          # valid at lanes 16*w' + c, c<8

        # ---- conv2 (+ folded BN) + ReLU: 3 banded matmuls (one per kh tap); the kw taps,
        #      the W halo and the pool don't-care lanes are folded into the weights. ------
        pw = jnp.concatenate([jnp.zeros((R2, 16), f32), p1, jnp.zeros((R2, 16), f32)],
                             axis=1)                                          # (8P, 160)
        rid = jax.lax.broadcasted_iota(jnp.int32, (R2, 160), 0)
        dn = jnp.concatenate([jnp.zeros((1, 160), f32), pw[:-1, :]], axis=0)  # input row h-1
        dn = jnp.where(rid % 8 == 0, 0.0, dn)              # per-image top halo
        up = jnp.concatenate([pw[1:, :], jnp.zeros((1, 160), f32)], axis=0)   # input row h+1
        up = jnp.where(rid % 8 == 7, 0.0, up)              # per-image bottom halo
        h2 = jnp.dot(dn.astype(bf16), cw2_ref[0], preferred_element_type=f32)
        h2 = h2 + jnp.dot(pw.astype(bf16), cw2_ref[1], preferred_element_type=f32)
        h2 = h2 + jnp.dot(up.astype(bf16), cw2_ref[2], preferred_element_type=f32)
        h2 = jnp.maximum(h2 + b_ref[1:2, :], 0.0)          # (8P,128): lanes = 16w + c

        # ---- maxpool 2x2 ----------------------------------------------------------------
        hq = h2.reshape(R3, 2, LANES)
        t2 = jnp.maximum(hq[:, 0, :], hq[:, 1, :])                            # (4P, 128)
        t2s = jnp.concatenate([t2[:, 16:], jnp.zeros((R3, 16), f32)], axis=1)
        p2 = jnp.maximum(t2, t2s)                          # valid at lanes 32*w' + c, c<16

        # ---- flatten: per image, 4 lane-aligned 128-wide pieces -> one 512-lane feature
        #      row; don't-care lanes hit all-zero rows of wf1 (order folded at prep time) --
        rows = [jnp.concatenate([p2[4 * i + j: 4 * i + j + 1, :] for j in range(4)], axis=1)
                for i in range(P)]                                            # P x (1, 512)
        feat = rows[0] if P == 1 else jnp.concatenate(rows, axis=0)           # (P, 512)
        if P < 8:
            feat = jnp.concatenate([feat, jnp.zeros((8 - P, 512), f32)], axis=0)

        # ---- fc_features: Linear+ReLU, Linear+ReLU (dropout = identity at eval) ----------
        h = jnp.dot(feat.astype(bf16), wf1_ref[...], preferred_element_type=f32) + b_ref[2:3, :]
        h = jnp.maximum(h, 0.0)
        h = jnp.dot(h.astype(bf16), wstk_ref[0], preferred_element_type=f32) + b_ref[3:4, :]
        h = jnp.maximum(h, 0.0)

        # ---- fc head (hiden_layer=3): Lin+ReLU, Lin+ReLU, Lin -----------------------------
        h = jnp.dot(h.astype(bf16), wstk_ref[1], preferred_element_type=f32) + b_ref[4:5, :]
        h = jnp.maximum(h, 0.0)
        h = jnp.dot(h.astype(bf16), wstk_ref[2], preferred_element_type=f32) + b_ref[5:6, :]
        h = jnp.maximum(h, 0.0)
        out = jnp.dot(h.astype(bf16), wstk_ref[3], preferred_element_type=f32) + b_ref[6:7, :]

        # ---- tanh -> classify (pre-norm, as in torch) -> L2 normalize ---------------------
        code = jnp.tanh(out)                               # (8,128); lanes >= BIT exactly 0
        pred = jnp.dot(code.astype(bf16), wstk_ref[4], preferred_element_type=f32) + b_ref[7:8, :]
        inv = jax.lax.rsqrt(jnp.sum(code * code, axis=1, keepdims=True) + 1e-12)
        code_ref[...] = (code * inv).astype(code_ref.dtype)
        pred_ref[...] = pred.astype(pred_ref.dtype)

    return kernel


# ----------------------------------------------------------------------------
# pallas_call wrapper
# ----------------------------------------------------------------------------
def _imgs_per_step(batch):
    # batch images into the matmuls' M dim, but keep >= 2 grid steps so both v7x
    # TensorCores get work; 8 images fill the 8-sublane M tile exactly.
    return max(1, min(8, batch // 2))


def _imgnet_pallas(patches, wargs, P):
    cw1, cw2, wf1, wstk, biases = wargs
    G = patches.shape[0] // (P * _H)

    in_specs = [
        pl.BlockSpec((P * _H, X_K), lambda g: (g, 0)),          # conv1 im2col patches
        pl.BlockSpec(cw1.shape, lambda g: (0, 0)),
        pl.BlockSpec(cw2.shape, lambda g: (0, 0, 0)),
        pl.BlockSpec(wf1.shape, lambda g: (0, 0)),
        pl.BlockSpec(wstk.shape, lambda g: (0, 0, 0)),
        pl.BlockSpec(biases.shape, lambda g: (0, 0)),
    ]
    out_specs = (pl.BlockSpec((8, LANES), lambda g: (g, 0)),
                 pl.BlockSpec((8, LANES), lambda g: (g, 0)))

    return pl.pallas_call(
        _make_kernel(P),
        grid=(G,),
        in_specs=in_specs,
        out_specs=out_specs,
        out_shape=(jax.ShapeDtypeStruct((G * 8, LANES), jnp.float32),
                   jax.ShapeDtypeStruct((G * 8, LANES), jnp.float32)),
        compiler_params=pltpu.CompilerParams(
            dimension_semantics=("parallel",)),                 # shards steps on v7x's 2 TCs
    )(patches, cw1, cw2, wf1, wstk, biases)


# ----------------------------------------------------------------------------
# parameters
# ----------------------------------------------------------------------------
def init_params(key):
    ks = jax.random.split(key, 12)

    def lin(k, din, dout):
        kw, kb = jax.random.split(k)
        w = jax.random.normal(kw, (din, dout), jnp.float32) / jnp.sqrt(float(din))
        b = 0.01 * jax.random.normal(kb, (dout,), jnp.float32)
        return w, b

    p = {}
    p['conv1_w'] = jax.random.normal(ks[0], (3, 3, 3, 8), jnp.float32) / jnp.sqrt(27.0)
    p['bn1_scale'] = 1.0 + 0.1 * jax.random.normal(ks[1], (8,), jnp.float32)
    p['bn1_shift'] = 0.1 * jax.random.normal(ks[2], (8,), jnp.float32)
    p['conv2_w'] = jax.random.normal(ks[3], (3, 3, 8, 16), jnp.float32) / jnp.sqrt(72.0)
    p['bn2_scale'] = 1.0 + 0.1 * jax.random.normal(ks[4], (16,), jnp.float32)
    p['bn2_shift'] = 0.1 * jax.random.normal(ks[5], (16,), jnp.float32)
    # VGG fc_features (classifier[:-2]): Linear+ReLU, (Dropout), Linear+ReLU
    p['wf1'], p['bf1'] = lin(ks[6], 16 * 4 * 4, FEAT_DIM)   # rows in torch NCHW flatten order
    p['wf2'], p['bf2'] = lin(ks[7], FEAT_DIM, FEAT_DIM)
    # fc head (hiden_layer=3)
    p['w1'], p['b1'] = lin(ks[8], FEAT_DIM, MID)
    p['w2'], p['b2'] = lin(ks[9], MID, MID)
    p['w3'], p['b3'] = lin(ks[10], MID, BIT)
    # classify
    p['wc'], p['bc'] = lin(ks[11], BIT, NUM_CLASSES)
    return p


def prepare_params(p):
    """One-time prep (all loop-invariant work kept out of the kernel):
      * fold eval-mode BN into conv weights (scale) and biases (shift)
      * conv1: pad Cin 3->8 and build a block-diagonal (1152,128) weight so one matmul
        does im2col x W and emits the activation lane-dense as (H, W*C)
      * conv2: fold the 3 kw taps, the W halo and the pool's don't-care lanes into three
        banded (160,128) weights (one per kh tap)
      * wf1: scatter rows so the kernel's flatten order matches torch's NCHW flatten;
        don't-care feature lanes map to all-zero rows
      * pad bit/num_classes dims to 128 lanes; stack weights/biases into few operands;
        cast every MXU operand to bf16."""
    f32, bf16 = jnp.float32, jnp.bfloat16

    # conv1: Cin 3 -> 8 zero pad, fold BN scale, block-diag over the 16 W positions
    w = jnp.pad(p['conv1_w'], ((0, 0), (0, 0), (0, CIN_PAD - p['conv1_w'].shape[2]), (0, 0)))
    w = w * p['bn1_scale'][None, None, None, :]
    w1col = w.reshape(9 * CIN_PAD, 8)                                  # (72, 8)
    cw1 = jnp.kron(jnp.eye(_H, dtype=f32), w1col).astype(bf16)         # (1152, 128)
    cb1 = jnp.tile(p['bn1_shift'], _H)                                 # lane = 8w + c

    # conv2: fold BN scale; banded (160,128) per kh. LHS lanes are 16*wp + cin with
    # wp = padded input col (0..9) and only cin<8 carrying data (pool don't-cares -> 0 rows).
    w2 = p['conv2_w'] * p['bn2_scale'][None, None, None, :]
    cw2_list = []
    for kh in range(3):
        m = jnp.zeros((160, LANES), f32)
        for kw in range(3):
            blk = jnp.zeros((16, 16), f32).at[:8, :].set(w2[kh, kw])   # (cin-slot, cout)
            m = m + jnp.kron(jnp.eye(10, 8, k=-kw, dtype=f32), blk)    # wp = wo + kw band
        cw2_list.append(m)
    cw2 = jnp.stack(cw2_list).astype(bf16)                             # (3, 160, 128)
    cb2 = jnp.tile(p['bn2_shift'], 8)                                  # lane = 16w + c

    # wf1: kernel feature lane k = h*128 + w*32 + c (c<16 valid); torch row = c*16 + h*4 + w
    wf1_t = p['wf1'].reshape(16, 4, 4, FEAT_DIM)                       # (c, h, w, n)
    blk = jnp.transpose(wf1_t, (1, 2, 0, 3))                           # (h, w, c, n)
    blk = jnp.concatenate([blk, jnp.zeros_like(blk)], axis=2)          # slots >=16: zero rows
    wf1 = blk.reshape(4 * 128, FEAT_DIM).astype(bf16)                  # (512, 128)

    # pad bit / num_classes dims to 128 lanes (zero cols/rows => padded outputs are exactly
    # 0, sliced off in the wrapper); stack the 128x128 weights and the 128-wide biases.
    w3p = jnp.zeros((MID, LANES), f32).at[:, :BIT].set(p['w3'])
    wcp = jnp.zeros((LANES, LANES), f32).at[:BIT, :NUM_CLASSES].set(p['wc'])
    wstk = jnp.stack([p['wf2'], p['w1'], p['w2'], w3p, wcp]).astype(bf16)     # (5,128,128)
    b3p = jnp.zeros((LANES,), f32).at[:BIT].set(p['b3'])
    bcp = jnp.zeros((LANES,), f32).at[:NUM_CLASSES].set(p['bc'])
    biases = jnp.stack([cb1, cb2, p['bf1'], p['bf2'], p['b1'], p['b2'], b3p, bcp]
                       ).astype(f32)                                           # (8, 128)

    return (cw1, cw2, wf1, wstk, biases)


# ----------------------------------------------------------------------------
# forward
# ----------------------------------------------------------------------------
@jax.jit
def imgnet_forward(wargs, x_nchw):
    B = x_nchw.shape[0]
    P = _imgs_per_step(B)
    B_pad = ((B + P - 1) // P) * P
    G = B_pad // P

    # NCHW (PyTorch) -> NHWC, pad channels 3 -> 8, 3x3 halo, and zero-pad batch to G*P
    x = jnp.transpose(x_nchw, (0, 2, 3, 1)).astype(jnp.float32)
    x = jnp.pad(x, ((0, B_pad - B), (1, 1), (1, 1), (0, CIN_PAD - x.shape[-1])))
    # conv1 im2col hoisted out of the kernel (lane-dense bf16 patches, ~36 KB/image DMA)
    cols = [x[:, kh:kh + _H, kw:kw + _H, :] for kh in range(3) for kw in range(3)]
    patches = jnp.stack(cols, axis=3)                                  # (B', 16, 16, 9, 8)
    patches = patches.reshape(B_pad * _H, X_K).astype(jnp.bfloat16)    # row = img*16 + h

    code_pad, pred_pad = _imgnet_pallas(patches, wargs, P)

    code = code_pad.reshape(G, 8, LANES)[:, :P, :].reshape(G * P, LANES)[:B, :BIT]
    pred = pred_pad.reshape(G, 8, LANES)[:, :P, :].reshape(G * P, LANES)[:B, :NUM_CLASSES]
    return code, pred


if __name__ == "__main__":
    key = jax.random.PRNGKey(0)
    k_param, k_x = jax.random.split(key)
    # input consistent with the module: NCHW RGB image batch
    x = jax.random.normal(k_x, (2, 3, _H, _H), jnp.float32)
    params = init_params(k_param)
    wargs = prepare_params(params)      # one-time parameter prep (loop-invariant work)

    code, pred = imgnet_forward(wargs, x)
    jax.block_until_ready((code, pred))

    assert code.shape == (2, BIT), code.shape
    assert pred.shape == (2, NUM_CLASSES), pred.shape
    assert bool(jnp.all(jnp.isfinite(code))) and bool(jnp.all(jnp.isfinite(pred)))
    # normalized codes should have (approximately) unit L2 norm along dim=1
    norms = jnp.linalg.norm(code, axis=1)
    assert bool(jnp.all(jnp.abs(norms - 1.0) < 2e-3)), norms
    print("KERNEL_OK")
</pallas_src>

<mosaic_0001>
module attributes {stable_mosaic.version = 11 : i64} {
  func.func @kernel(%arg0: i32, %arg1: memref<16x1152xbf16, #tpu.memory_space<vmem>>, %arg2: memref<1152x128xbf16, #tpu.memory_space<vmem>>, %arg3: memref<3x160x128xbf16, #tpu.memory_space<vmem>>, %arg4: memref<512x128xbf16, #tpu.memory_space<vmem>>, %arg5: memref<5x128x128xbf16, #tpu.memory_space<vmem>>, %arg6: memref<8x128xf32, #tpu.memory_space<vmem>>, %arg7: memref<8x128xf32, #tpu.memory_space<vmem>>, %arg8: memref<8x128xf32, #tpu.memory_space<vmem>>) attributes {dimension_semantics = [#tpu.dimension_semantics<parallel>], iteration_bounds = array<i64: 2>, scalar_prefetch = 0 : i64, scratch_operands = 0 : i64, tpu.core_type = #tpu.core_type<tc>, window_params = [{transform_indices = @transform_0, window_bounds = array<i64: 16, 1152>}, {pipeline_mode = #tpu.pipeline_mode<synchronous>, transform_indices = @transform_1, window_bounds = array<i64: 1152, 128>}, {pipeline_mode = #tpu.pipeline_mode<synchronous>, transform_indices = @transform_2, window_bounds = array<i64: 3, 160, 128>}, {pipeline_mode = #tpu.pipeline_mode<synchronous>, transform_indices = @transform_3, window_bounds = array<i64: 512, 128>}, {pipeline_mode = #tpu.pipeline_mode<synchronous>, transform_indices = @transform_4, window_bounds = array<i64: 5, 128, 128>}, {pipeline_mode = #tpu.pipeline_mode<synchronous>, transform_indices = @transform_5, window_bounds = array<i64: 8, 128>}, {transform_indices = @transform_6, window_bounds = array<i64: 8, 128>}, {transform_indices = @transform_7, window_bounds = array<i64: 8, 128>}]} {
    %c0 = arith.constant 0 : index
    %c0_0 = arith.constant 0 : index
    %0 = vector.load %arg1[%c0, %c0_0] : memref<16x1152xbf16, #tpu.memory_space<vmem>>, vector<16x1152xbf16>
    %c0_1 = arith.constant 0 : index
    %c0_2 = arith.constant 0 : index
    %1 = vector.load %arg2[%c0_1, %c0_2] : memref<1152x128xbf16, #tpu.memory_space<vmem>>, vector<1152x128xbf16>
    %cst = arith.constant dense<0.000000e+00> : vector<16x128xf32>
    %2 = tpu.matmul %0, %1, %cst {dimension_numbers = #tpu.dot_dimension_numbers<[1], [0], [0], [1], [0, 0, 1, 1], [], []>} : vector<16x1152xbf16>, vector<1152x128xbf16>, vector<16x128xf32> -> vector<16x128xf32>
    %c0_3 = arith.constant 0 : index
    %c0_4 = arith.constant 0 : index
    %3 = vector.load %arg6[%c0_3, %c0_4] : memref<8x128xf32, #tpu.memory_space<vmem>>, vector<1x128xf32>
    %4 = vector.broadcast %3 : vector<1x128xf32> to vector<16x128xf32>
    %5 = arith.addf %2, %4 : vector<16x128xf32>
    %cst_5 = arith.constant 0.000000e+00 : f32
    %6 = vector.broadcast %cst_5 : f32 to vector<16x128xf32>
    %7 = arith.maximumf %5, %6 : vector<16x128xf32>
    %8 = vector.shape_cast %7 : vector<16x128xf32> to vector<8x2x128xf32>
    %9 = vector.extract_strided_slice %8 {offsets = [0, 0, 0], sizes = [8, 1, 128], strides = [1, 1, 1]} : vector<8x2x128xf32> to vector<8x1x128xf32>
    %10 = vector.shape_cast %9 : vector<8x1x128xf32> to vector<8x128xf32>
    %11 = vector.extract_strided_slice %8 {offsets = [0, 1, 0], sizes = [8, 1, 128], strides = [1, 1, 1]} : vector<8x2x128xf32> to vector<8x1x128xf32>
    %12 = vector.shape_cast %11 : vector<8x1x128xf32> to vector<8x128xf32>
    %13 = arith.maximumf %10, %12 : vector<8x128xf32>
    %14 = vector.extract_strided_slice %13 {offsets = [0, 8], sizes = [8, 120], strides = [1, 1]} : vector<8x128xf32> to vector<8x120xf32>
    %cst_6 = arith.constant 0.000000e+00 : f32
    %15 = vector.broadcast %cst_6 : f32 to vector<8x8xf32>
    %16 = tpu.concatenate %14, %15 in 1 : vector<8x120xf32>, vector<8x8xf32> -> vector<8x128xf32>
    %17 = arith.maximumf %13, %16 : vector<8x128xf32>
    %cst_7 = arith.constant 0.000000e+00 : f32
    %18 = vector.broadcast %cst_7 : f32 to vector<8x16xf32>
    %cst_8 = arith.constant 0.000000e+00 : f32
    %19 = vector.broadcast %cst_8 : f32 to vector<8x16xf32>
    %20 = tpu.concatenate %18, %17, %19 in 1 : vector<8x16xf32>, vector<8x128xf32>, vector<8x16xf32> -> vector<8x160xf32>
    %21 = tpu.iota {dimensions = array<i32: 0>} : vector<8x160xi32>
    %cst_9 = arith.constant 0.000000e+00 : f32
    %22 = vector.broadcast %cst_9 : f32 to vector<1x160xf32>
    %23 = vector.extract_strided_slice %20 {offsets = [0, 0], sizes = [7, 160], strides = [1, 1]} : vector<8x160xf32> to vector<7x160xf32>
    %24 = tpu.concatenate %22, %23 in 0 : vector<1x160xf32>, vector<7x160xf32> -> vector<8x160xf32>
    %c8_i32 = arith.constant 8 : i32
    %c0_i32 = arith.constant 0 : i32
    %25 = arith.cmpi eq, %c8_i32, %c0_i32 : i32
    %c1_i32 = arith.constant 1 : i32
    %26 = arith.select %25, %c1_i32, %c8_i32 : i32
    %27 = vector.broadcast %26 : i32 to vector<8x160xi32>
    %28 = arith.remsi %21, %27 : vector<8x160xi32>
    %c0_i32_10 = arith.constant 0 : i32
    %29 = vector.broadcast %c0_i32_10 : i32 to vector<8x160xi32>
    %30 = arith.cmpi ne, %28, %29 : vector<8x160xi32>
    %c0_i32_11 = arith.constant 0 : i32
    %31 = vector.broadcast %c0_i32_11 : i32 to vector<8x160xi32>
    %32 = arith.cmpi slt, %28, %31 : vector<8x160xi32>
    %c0_i32_12 = arith.constant 0 : i32
    %33 = arith.cmpi slt, %26, %c0_i32_12 : i32
    %34 = vector.broadcast %33 : i1 to vector<8x160xi1>
    %35 = vector.broadcast %34 : vector<8x160xi1> to vector<8x160xi1>
    %36 = arith.xori %32, %35 : vector<8x160xi1>
    %37 = arith.andi %36, %30 : vector<8x160xi1>
    %38 = vector.broadcast %26 : i32 to vector<8x160xi32>
    %39 = arith.addi %28, %38 : vector<8x160xi32>
    %40 = arith.select %37, %39, %28 : vector<8x160xi1>, vector<8x160xi32>
    %c0_i32_13 = arith.constant 0 : i32
    %41 = vector.broadcast %c0_i32_13 : i32 to vector<8x160xi32>
    %42 = arith.cmpi eq, %40, %41 : vector<8x160xi32>
    %cst_14 = arith.constant 0.000000e+00 : f32
    %43 = vector.broadcast %cst_14 : f32 to vector<8x160xf32>
    %44 = arith.select %42, %43, %24 : vector<8x160xi1>, vector<8x160xf32>
    %45 = vector.extract_strided_slice %20 {offsets = [1, 0], sizes = [7, 160], strides = [1, 1]} : vector<8x160xf32> to vector<7x160xf32>
    %cst_15 = arith.constant 0.000000e+00 : f32
    %46 = vector.broadcast %cst_15 : f32 to vector<1x160xf32>
    %47 = tpu.concatenate %45, %46 in 0 : vector<7x160xf32>, vector<1x160xf32> -> vector<8x160xf32>
    %c8_i32_16 = arith.constant 8 : i32
    %c0_i32_17 = arith.constant 0 : i32
    %48 = arith.cmpi eq, %c8_i32_16, %c0_i32_17 : i32
    %c1_i32_18 = arith.constant 1 : i32
    %49 = arith.select %48, %c1_i32_18, %c8_i32_16 : i32
    %50 = vector.broadcast %49 : i32 to vector<8x160xi32>
    %51 = arith.remsi %21, %50 : vector<8x160xi32>
    %c0_i32_19 = arith.constant 0 : i32
    %52 = vector.broadcast %c0_i32_19 : i32 to vector<8x160xi32>
    %53 = arith.cmpi ne, %51, %52 : vector<8x160xi32>
    %c0_i32_20 = arith.constant 0 : i32
    %54 = vector.broadcast %c0_i32_20 : i32 to vector<8x160xi32>
    %55 = arith.cmpi slt, %51, %54 : vector<8x160xi32>
    %c0_i32_21 = arith.constant 0 : i32
    %56 = arith.cmpi slt, %49, %c0_i32_21 : i32
    %57 = vector.broadcast %56 : i1 to vector<8x160xi1>
    %58 = vector.broadcast %57 : vector<8x160xi1> to vector<8x160xi1>
    %59 = arith.xori %55, %58 : vector<8x160xi1>
    %60 = arith.andi %59, %53 : vector<8x160xi1>
    %61 = vector.broadcast %49 : i32 to vector<8x160xi32>
    %62 = arith.addi %51, %61 : vector<8x160xi32>
    %63 = arith.select %60, %62, %51 : vector<8x160xi1>, vector<8x160xi32>
    %c7_i32 = arith.constant 7 : i32
    %64 = vector.broadcast %c7_i32 : i32 to vector<8x160xi32>
    %65 = arith.cmpi eq, %63, %64 : vector<8x160xi32>
    %cst_22 = arith.constant 0.000000e+00 : f32
    %66 = vector.broadcast %cst_22 : f32 to vector<8x160xf32>
    %67 = arith.select %65, %66, %47 : vector<8x160xi1>, vector<8x160xf32>
    %68 = arith.truncf %44 : vector<8x160xf32> to vector<8x160xbf16>
    %c0_23 = arith.constant 0 : index
    %c0_24 = arith.constant 0 : index
    %c0_25 = arith.constant 0 : index
    %69 = vector.load %arg3[%c0_23, %c0_24, %c0_25] : memref<3x160x128xbf16, #tpu.memory_space<vmem>>, vector<1x160x128xbf16>
    %70 = vector.shape_cast %69 : vector<1x160x128xbf16> to vector<160x128xbf16>
    %cst_26 = arith.constant dense<0.000000e+00> : vector<8x128xf32>
    %71 = tpu.matmul %68, %70, %cst_26 {dimension_numbers = #tpu.dot_dimension_numbers<[1], [0], [0], [1], [0, 0, 1, 1], [], []>} : vector<8x160xbf16>, vector<160x128xbf16>, vector<8x128xf32> -> vector<8x128xf32>
    %72 = arith.truncf %20 : vector<8x160xf32> to vector<8x160xbf16>
    %c1 = arith.constant 1 : index
    %c0_27 = arith.constant 0 : index
    %c0_28 = arith.constant 0 : index
    %73 = vector.load %arg3[%c1, %c0_27, %c0_28] : memref<3x160x128xbf16, #tpu.memory_space<vmem>>, vector<1x160x128xbf16>
    %74 = vector.shape_cast %73 : vector<1x160x128xbf16> to vector<160x128xbf16>
    %cst_29 = arith.constant dense<0.000000e+00> : vector<8x128xf32>
    %75 = tpu.matmul %72, %74, %cst_29 {dimension_numbers = #tpu.dot_dimension_numbers<[1], [0], [0], [1], [0, 0, 1, 1], [], []>} : vector<8x160xbf16>, vector<160x128xbf16>, vector<8x128xf32> -> vector<8x128xf32>
    %76 = arith.addf %71, %75 : vector<8x128xf32>
    %77 = arith.truncf %67 : vector<8x160xf32> to vector<8x160xbf16>
    %c2 = arith.constant 2 : index
    %c0_30 = arith.constant 0 : index
    %c0_31 = arith.constant 0 : index
    %78 = vector.load %arg3[%c2, %c0_30, %c0_31] : memref<3x160x128xbf16, #tpu.memory_space<vmem>>, vector<1x160x128xbf16>
    %79 = vector.shape_cast %78 : vector<1x160x128xbf16> to vector<160x128xbf16>
    %cst_32 = arith.constant dense<0.000000e+00> : vector<8x128xf32>
    %80 = tpu.matmul %77, %79, %cst_32 {dimension_numbers = #tpu.dot_dimension_numbers<[1], [0], [0], [1], [0, 0, 1, 1], [], []>} : vector<8x160xbf16>, vector<160x128xbf16>, vector<8x128xf32> -> vector<8x128xf32>
    %81 = arith.addf %76, %80 : vector<8x128xf32>
    %c1_33 = arith.constant 1 : index
    %c0_34 = arith.constant 0 : index
    %82 = vector.load %arg6[%c1_33, %c0_34] : memref<8x128xf32, #tpu.memory_space<vmem>>, vector<1x128xf32>
    %83 = vector.broadcast %82 : vector<1x128xf32> to vector<8x128xf32>
    %84 = arith.addf %81, %83 : vector<8x128xf32>
    %cst_35 = arith.constant 0.000000e+00 : f32
    %85 = vector.broadcast %cst_35 : f32 to vector<8x128xf32>
    %86 = arith.maximumf %84, %85 : vector<8x128xf32>
    %87 = vector.shape_cast %86 : vector<8x128xf32> to vector<4x2x128xf32>
    %88 = vector.extract_strided_slice %87 {offsets = [0, 0, 0], sizes = [4, 1, 128], strides = [1, 1, 1]} : vector<4x2x128xf32> to vector<4x1x128xf32>
    %89 = vector.shape_cast %88 : vector<4x1x128xf32> to vector<4x128xf32>
    %90 = vector.extract_strided_slice %87 {offsets = [0, 1, 0], sizes = [4, 1, 128], strides = [1, 1, 1]} : vector<4x2x128xf32> to vector<4x1x128xf32>
    %91 = vector.shape_cast %90 : vector<4x1x128xf32> to vector<4x128xf32>
    %92 = arith.maximumf %89, %91 : vector<4x128xf32>
    %93 = vector.extract_strided_slice %92 {offsets = [0, 16], sizes = [4, 112], strides = [1, 1]} : vector<4x128xf32> to vector<4x112xf32>
    %cst_36 = arith.constant 0.000000e+00 : f32
    %94 = vector.broadcast %cst_36 : f32 to vector<4x16xf32>
    %95 = tpu.concatenate %93, %94 in 1 : vector<4x112xf32>, vector<4x16xf32> -> vector<4x128xf32>
    %96 = arith.maximumf %92, %95 : vector<4x128xf32>
    %97 = vector.extract_strided_slice %96 {offsets = [0, 0], sizes = [1, 128], strides = [1, 1]} : vector<4x128xf32> to vector<1x128xf32>
    %98 = vector.extract_strided_slice %96 {offsets = [1, 0], sizes = [1, 128], strides = [1, 1]} : vector<4x128xf32> to vector<1x128xf32>
    %99 = vector.extract_strided_slice %96 {offsets = [2, 0], sizes = [1, 128], strides = [1, 1]} : vector<4x128xf32> to vector<1x128xf32>
    %100 = vector.extract_strided_slice %96 {offsets = [3, 0], sizes = [1, 128], strides = [1, 1]} : vector<4x128xf32> to vector<1x128xf32>
    %101 = tpu.concatenate %97, %98, %99, %100 in 1 : vector<1x128xf32>, vector<1x128xf32>, vector<1x128xf32>, vector<1x128xf32> -> vector<1x512xf32>
    %cst_37 = arith.constant 0.000000e+00 : f32
    %102 = vector.broadcast %cst_37 : f32 to vector<7x512xf32>
    %103 = tpu.concatenate %101, %102 in 0 : vector<1x512xf32>, vector<7x512xf32> -> vector<8x512xf32>
    %104 = arith.truncf %103 : vector<8x512xf32> to vector<8x512xbf16>
    %c0_38 = arith.constant 0 : index
    %c0_39 = arith.constant 0 : index
    %105 = vector.load %arg4[%c0_38, %c0_39] : memref<512x128xbf16, #tpu.memory_space<vmem>>, vector<512x128xbf16>
    %cst_40 = arith.constant dense<0.000000e+00> : vector<8x128xf32>
    %106 = tpu.matmul %104, %105, %cst_40 {dimension_numbers = #tpu.dot_dimension_numbers<[1], [0], [0], [1], [0, 0, 1, 1], [], []>} : vector<8x512xbf16>, vector<512x128xbf16>, vector<8x128xf32> -> vector<8x128xf32>
    %c2_41 = arith.constant 2 : index
    %c0_42 = arith.constant 0 : index
    %107 = vector.load %arg6[%c2_41, %c0_42] : memref<8x128xf32, #tpu.memory_space<vmem>>, vector<1x128xf32>
    %108 = vector.broadcast %107 : vector<1x128xf32> to vector<8x128xf32>
    %109 = arith.addf %106, %108 : vector<8x128xf32>
    %cst_43 = arith.constant 0.000000e+00 : f32
    %110 = vector.broadcast %cst_43 : f32 to vector<8x128xf32>
    %111 = arith.maximumf %109, %110 : vector<8x128xf32>
    %112 = arith.truncf %111 : vector<8x128xf32> to vector<8x128xbf16>
    %c0_44 = arith.constant 0 : index
    %c0_45 = arith.constant 0 : index
    %c0_46 = arith.constant 0 : index
    %113 = vector.load %arg5[%c0_44, %c0_45, %c0_46] : memref<5x128x128xbf16, #tpu.memory_space<vmem>>, vector<1x128x128xbf16>
    %114 = vector.shape_cast %113 : vector<1x128x128xbf16> to vector<128x128xbf16>
    %cst_47 = arith.constant dense<0.000000e+00> : vector<8x128xf32>
    %115 = tpu.matmul %112, %114, %cst_47 {dimension_numbers = #tpu.dot_dimension_numbers<[1], [0], [0], [1], [0, 0, 1, 1], [], []>} : vector<8x128xbf16>, vector<128x128xbf16>, vector<8x128xf32> -> vector<8x128xf32>
    %c3 = arith.constant 3 : index
    %c0_48 = arith.constant 0 : index
    %116 = vector.load %arg6[%c3, %c0_48] : memref<8x128xf32, #tpu.memory_space<vmem>>, vector<1x128xf32>
    %117 = vector.broadcast %116 : vector<1x128xf32> to vector<8x128xf32>
    %118 = arith.addf %115, %117 : vector<8x128xf32>
    %cst_49 = arith.constant 0.000000e+00 : f32
    %119 = vector.broadcast %cst_49 : f32 to vector<8x128xf32>
    %120 = arith.maximumf %118, %119 : vector<8x128xf32>
    %121 = arith.truncf %120 : vector<8x128xf32> to vector<8x128xbf16>
    %c1_50 = arith.constant 1 : index
    %c0_51 = arith.constant 0 : index
    %c0_52 = arith.constant 0 : index
    %122 = vector.load %arg5[%c1_50, %c0_51, %c0_52] : memref<5x128x128xbf16, #tpu.memory_space<vmem>>, vector<1x128x128xbf16>
    %123 = vector.shape_cast %122 : vector<1x128x128xbf16> to vector<128x128xbf16>
    %cst_53 = arith.constant dense<0.000000e+00> : vector<8x128xf32>
    %124 = tpu.matmul %121, %123, %cst_53 {dimension_numbers = #tpu.dot_dimension_numbers<[1], [0], [0], [1], [0, 0, 1, 1], [], []>} : vector<8x128xbf16>, vector<128x128xbf16>, vector<8x128xf32> -> vector<8x128xf32>
    %c4 = arith.constant 4 : index
    %c0_54 = arith.constant 0 : index
    %125 = vector.load %arg6[%c4, %c0_54] : memref<8x128xf32, #tpu.memory_space<vmem>>, vector<1x128xf32>
    %126 = vector.broadcast %125 : vector<1x128xf32> to vector<8x128xf32>
    %127 = arith.addf %124, %126 : vector<8x128xf32>
    %cst_55 = arith.constant 0.000000e+00 : f32
    %128 = vector.broadcast %cst_55 : f32 to vector<8x128xf32>
    %129 = arith.maximumf %127, %128 : vector<8x128xf32>
    %130 = arith.truncf %129 : vector<8x128xf32> to vector<8x128xbf16>
    %c2_56 = arith.constant 2 : index
    %c0_57 = arith.constant 0 : index
    %c0_58 = arith.constant 0 : index
    %131 = vector.load %arg5[%c2_56, %c0_57, %c0_58] : memref<5x128x128xbf16, #tpu.memory_space<vmem>>, vector<1x128x128xbf16>
    %132 = vector.shape_cast %131 : vector<1x128x128xbf16> to vector<128x128xbf16>
    %cst_59 = arith.constant dense<0.000000e+00> : vector<8x128xf32>
    %133 = tpu.matmul %130, %132, %cst_59 {dimension_numbers = #tpu.dot_dimension_numbers<[1], [0], [0], [1], [0, 0, 1, 1], [], []>} : vector<8x128xbf16>, vector<128x128xbf16>, vector<8x128xf32> -> vector<8x128xf32>
    %c5 = arith.constant 5 : index
    %c0_60 = arith.constant 0 : index
    %134 = vector.load %arg6[%c5, %c0_60] : memref<8x128xf32, #tpu.memory_space<vmem>>, vector<1x128xf32>
    %135 = vector.broadcast %134 : vector<1x128xf32> to vector<8x128xf32>
    %136 = arith.addf %133, %135 : vector<8x128xf32>
    %cst_61 = arith.constant 0.000000e+00 : f32
    %137 = vector.broadcast %cst_61 : f32 to vector<8x128xf32>
    %138 = arith.maximumf %136, %137 : vector<8x128xf32>
    %139 = arith.truncf %138 : vector<8x128xf32> to vector<8x128xbf16>
    %c3_62 = arith.constant 3 : index
    %c0_63 = arith.constant 0 : index
    %c0_64 = arith.constant 0 : index
    %140 = vector.load %arg5[%c3_62, %c0_63, %c0_64] : memref<5x128x128xbf16, #tpu.memory_space<vmem>>, vector<1x128x128xbf16>
    %141 = vector.shape_cast %140 : vector<1x128x128xbf16> to vector<128x128xbf16>
    %cst_65 = arith.constant dense<0.000000e+00> : vector<8x128xf32>
    %142 = tpu.matmul %139, %141, %cst_65 {dimension_numbers = #tpu.dot_dimension_numbers<[1], [0], [0], [1], [0, 0, 1, 1], [], []>} : vector<8x128xbf16>, vector<128x128xbf16>, vector<8x128xf32> -> vector<8x128xf32>
    %c6 = arith.constant 6 : index
    %c0_66 = arith.constant 0 : index
    %143 = vector.load %arg6[%c6, %c0_66] : memref<8x128xf32, #tpu.memory_space<vmem>>, vector<1x128xf32>
    %144 = vector.broadcast %143 : vector<1x128xf32> to vector<8x128xf32>
    %145 = arith.addf %142, %144 : vector<8x128xf32>
    %146 = math.tanh %145 : vector<8x128xf32>
    %147 = arith.truncf %146 : vector<8x128xf32> to vector<8x128xbf16>
    %c4_67 = arith.constant 4 : index
    %c0_68 = arith.constant 0 : index
    %c0_69 = arith.constant 0 : index
    %148 = vector.load %arg5[%c4_67, %c0_68, %c0_69] : memref<5x128x128xbf16, #tpu.memory_space<vmem>>, vector<1x128x128xbf16>
    %149 = vector.shape_cast %148 : vector<1x128x128xbf16> to vector<128x128xbf16>
    %cst_70 = arith.constant dense<0.000000e+00> : vector<8x128xf32>
    %150 = tpu.matmul %147, %149, %cst_70 {dimension_numbers = #tpu.dot_dimension_numbers<[1], [0], [0], [1], [0, 0, 1, 1], [], []>} : vector<8x128xbf16>, vector<128x128xbf16>, vector<8x128xf32> -> vector<8x128xf32>
    %c7 = arith.constant 7 : index
    %c0_71 = arith.constant 0 : index
    %151 = vector.load %arg6[%c7, %c0_71] : memref<8x128xf32, #tpu.memory_space<vmem>>, vector<1x128xf32>
    %152 = vector.broadcast %151 : vector<1x128xf32> to vector<8x128xf32>
    %153 = arith.addf %150, %152 : vector<8x128xf32>
    %154 = arith.mulf %146, %146 : vector<8x128xf32>
    %cst_72 = arith.constant dense<0.000000e+00> : vector<8xf32>
    %155 = vector.multi_reduction <add>, %154, %cst_72 [1] : vector<8x128xf32> to vector<8xf32>
    %156 = vector.shape_cast %155 : vector<8xf32> to vector<8x1xf32>
    %cst_73 = arith.constant 9.99999996E-13 : f32
    %157 = vector.broadcast %cst_73 : f32 to vector<8x1xf32>
    %158 = arith.addf %156, %157 : vector<8x1xf32>
    %159 = math.rsqrt %158 : vector<8x1xf32>
    %160 = vector.broadcast %159 : vector<8x1xf32> to vector<8x128xf32>
    %161 = arith.mulf %146, %160 : vector<8x128xf32>
    %c0_74 = arith.constant 0 : index
    %c0_75 = arith.constant 0 : index
    %162 = vector.load %arg7[%c0_74, %c0_75] : memref<8x128xf32, #tpu.memory_space<vmem>>, vector<8x128xf32>
    tpu.vector_store %arg7[%c0_74, %c0_75], %161 {strides = array<i32>} : memref<8x128xf32, #tpu.memory_space<vmem>>, vector<8x128xf32>,
    %c0_76 = arith.constant 0 : index
    %c0_77 = arith.constant 0 : index
    %163 = vector.load %arg8[%c0_76, %c0_77] : memref<8x128xf32, #tpu.memory_space<vmem>>, vector<8x128xf32>
    tpu.vector_store %arg8[%c0_76, %c0_77], %153 {strides = array<i32>} : memref<8x128xf32, #tpu.memory_space<vmem>>, vector<8x128xf32>,
    return
  }
  func.func @transform_0(%arg0: i32) -> (i32, i32) {
    %c0_i32 = arith.constant 0 : i32
    %c0_i32_0 = arith.constant 0 : i32
    return %arg0, %c0_i32 : i32, i32
  }
  func.func @transform_1(%arg0: i32) -> (i32, i32) {
    %c0_i32 = arith.constant 0 : i32
    %c0_i32_0 = arith.constant 0 : i32
    %c0_i32_1 = arith.constant 0 : i32
    return %c0_i32, %c0_i32_0 : i32, i32
  }
  func.func @transform_2(%arg0: i32) -> (i32, i32, i32) {
    %c0_i32 = arith.constant 0 : i32
    %c0_i32_0 = arith.constant 0 : i32
    %c0_i32_1 = arith.constant 0 : i32
    %c0_i32_2 = arith.constant 0 : i32
    return %c0_i32, %c0_i32_0, %c0_i32_1 : i32, i32, i32
  }
  func.func @transform_3(%arg0: i32) -> (i32, i32) {
    %c0_i32 = arith.constant 0 : i32
    %c0_i32_0 = arith.constant 0 : i32
    %c0_i32_1 = arith.constant 0 : i32
    return %c0_i32, %c0_i32_0 : i32, i32
  }
  func.func @transform_4(%arg0: i32) -> (i32, i32, i32) {
    %c0_i32 = arith.constant 0 : i32
    %c0_i32_0 = arith.constant 0 : i32
    %c0_i32_1 = arith.constant 0 : i32
    %c0_i32_2 = arith.constant 0 : i32
    return %c0_i32, %c0_i32_0, %c0_i32_1 : i32, i32, i32
  }
  func.func @transform_5(%arg0: i32) -> (i32, i32) {
    %c0_i32 = arith.constant 0 : i32
    %c0_i32_0 = arith.constant 0 : i32
    %c0_i32_1 = arith.constant 0 : i32
    return %c0_i32, %c0_i32_0 : i32, i32
  }
  func.func @transform_6(%arg0: i32) -> (i32, i32) {
    %c0_i32 = arith.constant 0 : i32
    %c0_i32_0 = arith.constant 0 : i32
    return %arg0, %c0_i32 : i32, i32
  }
  func.func @transform_7(%arg0: i32) -> (i32, i32) {
    %c0_i32 = arith.constant 0 : i32
    %c0_i32_0 = arith.constant 0 : i32
    return %arg0, %c0_i32 : i32, i32
  }
}

</mosaic_0001>

<bundles_post_ra>
// kernel: imgnet_forward.1
= control target key start
LH: loop header
LB: loop body
LE: loop exit
PB: predicated region body
PF: predicated region fallthrough
CT: control target
= control target key end

     0   :  { %s3787_s24 = smov 0   ;;  %s4578_s0 = inlined_call_operand.vmem [shape: bf16[32,1152], index: 0, kind: input, shape index: {}]   ;;  %s4579_s1 = inlined_call_operand.vmem [shape: bf16[1152,128], index: 1, kind: input, shape index: {}]   ;;  %s4580_s2 = inlined_call_operand.vmem [shape: bf16[3,160,128], index: 2, kind: input, shape index: {}]   ;;  %s4581_s3 = inlined_call_operand.vmem [shape: bf16[512,128], index: 3, kind: input, shape index: {}]   ;;  %s4582_s4 = inlined_call_operand.vmem [shape: bf16[5,128,128], index: 4, kind: input, shape index: {}]   ;;  %s4583_s5 = inlined_call_operand.vmem [shape: f32[8,128], index: 5, kind: input, shape index: {}]   ;;  %s4584_s6 = inlined_call_operand.vmem [shape: f32[16,128], index: 6, kind: output, shape index: {0}]   ;;  %s4585_s7 = inlined_call_operand.vmem [shape: f32[16,128], index: 7, kind: output, shape index: {1}]  }
   0x1 LB: > { %s3793_s25 = sadd.s32 4294967295, %s3738_s24   ;;  %p2875_p0 = scmp.ge.s32.totalorder %s3738_s24, 1  ;;  %s3738_s24 = sphi %s3787_s24, %s18_s24  }
   0x2   : > { %p242_p1 = scmp.lt.s32.totalorder %s3738_s24, 3 }
   0x4   : > { %p243_p2 = pnand %p2875_p0, %p242_p1 }
   0x5   : > { %s2876_s10 = sshll.u32 (!%p243_p2), %s3793_s25, 1  ;;  %s3745_s11 = smov (!%p243_p2), 16  }
   0x6   : > { %246 = sbr.rel (%p243_p2) target bundleno = 2162 (0x872), region = 44  ;;  %p279_p3 = scmp.lt.s32.totalorder (!%p243_p2), %s2876_s10, 3 }
   0x7   : > { %p285_p4 = scmp.lt.s32.totalorder (!%p243_p2), %s3793_s25, 1 }
   0xb   : > { %v3541_v0 = vld [vmem:[%s4579_s1 + $0x78] sm:$0xff]   ;;  %v3545_v4 = vld [vmem:[%s4579_s1 + $0x70] sm:$0xff]   ;;  %v3549_v8 = vld [vmem:[%s4579_s1 + $0x68] sm:$0xff]   ;;  %s4593_s10 = smov (!%p279_p3, %s2876_s10), 3  ;;  %vm3741_vm0 = vmmov 0   ;;  %vm1254_vm1 = vcmask 1041409  }
   0xc   : > { %v3542_v1 = vld [vmem:[%s4579_s1 + $0x38] sm:$0xff]   ;;  %3219 = vmatprep.subr.bf16.mxu0 %v3541_v0  ;;  %v3546_v5 = vld [vmem:[%s4579_s1 + $0x30] sm:$0xff]   ;;  %v3550_v9 = vld [vmem:[%s4579_s1 + $0x28] sm:$0xff]   ;;  %s3525_s13 = smul.u32 36, %s4593_s10  ;;  %vm1256_vm2 = vcmask 1042434   ;;  %vm1258_vm3 = vcmask 1043459  }
   0xd   : > { %v3543_v2 = vld [vmem:[%s4579_s1 + $0xf8] sm:$0xff]   ;;  %3220 = vmatpush3.bf16.msra.mxu0 %v3542_v1  ;;  %v3547_v6 = vld [vmem:[%s4579_s1 + $0xf0] sm:$0xff]   ;;  %v3551_v10 = vld [vmem:[%s4579_s1 + $0xe8] sm:$0xff]   ;;  %vm1260_vm4 = vcmask 1044484   ;;  %vm1262_vm5 = vcmask 1045509   ;;  %vm1264_vm6 = vcmask 1046534  }
   0xe   : > { %v3544_v3 = vld [vmem:[%s4579_s1 + $0xb8] sm:$0xff]   ;;  %3241 = vmatprep.subr.bf16.mxu1 %v3543_v2  ;;  %3221 = vmatprep.subr.bf16.mxu0 %v3545_v4  ;;  %v3548_v7 = vld [vmem:[%s4579_s1 + $0xb0] sm:$0xff]   ;;  %v3552_v11 = vld [vmem:[%s4579_s1 + $0xa8] sm:$0xff]   ;;  %s3888_s23 = scalar_lea.vmem %s4578_s0, %s3525_s13  ;;  %vm1266_vm7 = vcmask 1047559   ;;  %vm1271_vm8 = vcmask 982016   ;;  %vm1361_vm9 = vcmask 130048  }
   0xf   : > { %3242 = vmatpush3.bf16.msra.mxu1 %v3544_v3  ;;  %v3553_v12 = vld [vmem:[%s4579_s1 + $0x60] sm:$0xff]   ;;  %v3557_v16 = vld [vmem:[%s4579_s1 + $0x58] sm:$0xff]   ;;  %v3561_v20 = vld [vmem:[%s4579_s1 + $0x50] sm:$0xff]   ;;  %vm1372_vm11 = vcmask 1040384   ;;  %vm1394_vm12 = vcmask 1046528   ;;  %vm1505_vm15 = vcmask 261120  }
  0x10   : > { %3243 = vmatprep.subr.bf16.mxu1 %v3547_v6  ;;  %v3554_v13 = vld [vmem:[%s4579_s1 + $0x20] sm:$0xff]   ;;  %v3558_v17 = vld [vmem:[%s4579_s1 + $0x18] sm:$0xff]   ;;  %v3562_v21 = vld [vmem:[%s4579_s1 + $0x10] sm:$0xff]   ;;  %v3740_v6 = vmov 0.0   ;;  %s3746_s13 = smov 112   ;;  %s4595_s25 = smov (!%p285_p4, %s3793_s25), 1 }
  0x11   : > { %3222 = vmatpush3.bf16.msra.mxu0 %v3546_v5  ;;  %v3555_v14 = vld [vmem:[%s4579_s1 + $0xe0] sm:$0xff]   ;;  %v3559_v18 = vld [vmem:[%s4579_s1 + $0xd8] sm:$0xff]   ;;  %v3563_v22 = vld [vmem:[%s4579_s1 + $0xd0] sm:$0xff]   ;;  %s2878_s20 = sshll.u32 %s4595_s25, 3 }
  0x12   : > { %3223 = vmatprep.subr.bf16.mxu0 %v3549_v8  ;;  %v3556_v15 = vld [vmem:[%s4579_s1 + $0xa0] sm:$0xff]   ;;  %v3560_v19 = vld [vmem:[%s4579_s1 + $0x98] sm:$0xff]   ;;  %v3564_v23 = vld [vmem:[%s4579_s1 + $0x90] sm:$0xff]   ;;  %s288_s22 = scalar_lea.vmem %s4584_s6, %s2878_s20  ;;  %s292_s30 = scalar_lea.vmem %s4585_s7, %s2878_s20 }
  0x13   : > { %3244 = vmatpush3.bf16.msra.mxu1 %v3548_v7  ;;  %v3565_v24 = vld [vmem:[%s4579_s1 + $0x48] sm:$0xff]   ;;  %v3569_v28 = vld [vmem:[%s4579_s1 + $0x40] sm:$0xff]   ;;  %v3576_v34 = vld [vmem:[%s4579_s1 + $0x178] sm:$0xff]  }
  0x14   : > { %3245 = vmatprep.subr.bf16.mxu1 %v3551_v10  ;;  %v3566_v25 = vld [vmem:[%s4579_s1 + $0x8] sm:$0xff]   ;;  %v3570_v29 = vld [vmem:[%s4579_s1] sm:$0xff]   ;;  %v3580_v37 = vld [vmem:[%s4579_s1 + $0x138] sm:$0xff]  }
  0x15   : > { %3224 = vmatpush3.bf16.msra.mxu0 %v3550_v9  ;;  %v3567_v26 = vld [vmem:[%s4579_s1 + $0xc8] sm:$0xff]   ;;  %v3571_v30 = vld [vmem:[%s4579_s1 + $0xc0] sm:$0xff]   ;;  %v3581_v38 = vld [vmem:[%s4579_s1 + $0x1f8] sm:$0xff]  }
  0x16   : > { %3225 = vmatprep.subr.bf16.mxu0 %v3553_v12  ;;  %v3568_v27 = vld [vmem:[%s4579_s1 + $0x88] sm:$0xff]   ;;  %v3572_v31 = vld [vmem:[%s3888_s23] ss:$36 sps:$4 sm:$0xff]   ;;  %v3582_v39 = vld [vmem:[%s4579_s1 + $0x1b8] sm:$0xff]  }
  0x17   : > { %3246 = vmatpush3.bf16.msra.mxu1 %v3552_v11  ;;  %v3574_v32 = vld [vmem:[%s3888_s23 + $0x4] ss:$36 sps:$4 sm:$0xff]   ;;  %v3579_v36 = vld [vmem:[%s3888_s23 + $0xc] ss:$36 sps:$4 sm:$0xff]   ;;  %v3595_v52 = vld [vmem:[%s4579_s1 + $0x158] sm:$0xff]  }
  0x18   : > { %3247 = vmatprep.subr.bf16.mxu1 %v3555_v14  ;;  %v3575_v33 = vld [vmem:[%s4579_s1 + $0x80] sm:$0xff]   ;;  %963 = vmatprep.mubr.bf16.mxu0 %v3574_v32  ;;  %v3577_v35 = vld [vmem:[%s3888_s23 + $0x8] ss:$36 sps:$4 sm:$0xff]   ;;  %v3583_v40 = vld [vmem:[%s4579_s1 + $0x170] sm:$0xff]  }
  0x19   : > { %3226 = vmatpush3.bf16.msra.mxu0 %v3554_v13  ;;  %1004 = vmatprep.mubr.bf16.mxu1 %v3579_v36  ;;  %v3584_v41 = vld [vmem:[%s4579_s1 + $0x130] sm:$0xff]   ;;  %v3587_v44 = vld [vmem:[%s4579_s1 + $0x168] sm:$0xff]   ;;  %v3591_v48 = vld [vmem:[%s4579_s1 + $0x160] sm:$0xff]  }
  0x1a   : > { %3227 = vmatprep.subr.bf16.mxu0 %v3557_v16  ;;  %v3585_v42 = vld [vmem:[%s4579_s1 + $0x1f0] sm:$0xff]   ;;  %v3588_v45 = vld [vmem:[%s4579_s1 + $0x128] sm:$0xff]   ;;  %v3592_v49 = vld [vmem:[%s4579_s1 + $0x120] sm:$0xff]  }
  0x1b   : > { %3248 = vmatpush3.bf16.msra.mxu1 %v3556_v15  ;;  %v3586_v43 = vld [vmem:[%s4579_s1 + $0x1b0] sm:$0xff]   ;;  %v3589_v46 = vld [vmem:[%s4579_s1 + $0x1e8] sm:$0xff]   ;;  %v3593_v50 = vld [vmem:[%s4579_s1 + $0x1e0] sm:$0xff]  }
  0x1c   : > { %3249 = vmatprep.subr.bf16.mxu1 %v3559_v18  ;;  %v3590_v47 = vld [vmem:[%s4579_s1 + $0x1a8] sm:$0xff]   ;;  %v3594_v51 = vld [vmem:[%s4579_s1 + $0x1a0] sm:$0xff]   ;;  %v3596_v53 = vld [vmem:[%s4579_s1 + $0x118] sm:$0xff]  }
  0x1d   : > { %3228 = vmatpush3.bf16.msra.mxu0 %v3558_v17  ;;  %v3597_v54 = vld [vmem:[%s4579_s1 + $0x1d8] sm:$0xff]   ;;  %v3599_v56 = vld [vmem:[%s4579_s1 + $0x150] sm:$0xff]   ;;  %v3603_v60 = vld [vmem:[%s4579_s1 + $0x148] sm:$0xff]  }
  0x1e   : > { %3229 = vmatprep.subr.bf16.mxu0 %v3561_v20  ;;  %v3598_v55 = vld [vmem:[%s4579_s1 + $0x198] sm:$0xff]   ;;  %v3600_v57 = vld [vmem:[%s4579_s1 + $0x110] sm:$0xff]   ;;  %v3604_v61 = vld [vmem:[%s4579_s1 + $0x108] sm:$0xff]  }
  0x1f   : > { %3250 = vmatpush3.bf16.msra.mxu1 %v3560_v19  ;;  %v3601_v58 = vld [vmem:[%s4579_s1 + $0x1d0] sm:$0xff]   ;;  %v3605_v62 = vld [vmem:[%s4579_s1 + $0x1c8] sm:$0xff]   ;;  %v3607_v0 = vld [vmem:[%s4579_s1 + $0x140] sm:$0xff]  }
  0x20   : > { %3251 = vmatprep.subr.bf16.mxu1 %v3563_v22  ;;  %v3602_v59 = vld [vmem:[%s4579_s1 + $0x190] sm:$0xff]   ;;  %v3606_v63 = vld [vmem:[%s4579_s1 + $0x188] sm:$0xff]   ;;  %v3608_v1 = vld [vmem:[%s4579_s1 + $0x100] sm:$0xff]  }
  0x21   : > { %3230 = vmatpush3.bf16.msra.mxu0 %v3562_v21  ;;  %v3609_v2 = vld [vmem:[%s4579_s1 + $0x1c0] sm:$0xff]   ;;  %v3610_v3 = vld [vmem:[%s3888_s23 + $0x10] ss:$36 sps:$4 sm:$0xff]   ;;  %v3614_v7 = vld [vmem:[%s3888_s23 + $0x18] ss:$36 sps:$4 sm:$0xff]  }
  0x22   : > { %3231 = vmatprep.subr.bf16.mxu0 %v3565_v24  ;;  %v3612_v4 = vld [vmem:[%s3888_s23 + $0x14] ss:$36 sps:$4 sm:$0xff]   ;;  %v3613_v5 = vld [vmem:[%s4579_s1 + $0x180] sm:$0xff]   ;;  %v3619_v11 = vld [vmem:[%s4579_s1 + $0x228] sm:$0xff]  }
  0x23   : > { %3252 = vmatpush3.bf16.msra.mxu1 %v3564_v23  ;;  %v3616_v8 = vld [vmem:[%s3888_s23 + $0x1c] ss:$36 sps:$4 sm:$0xff]   ;;  %v3618_v10 = vld [vmem:[%s4579_s1 + $0x230] sm:$0xff]   ;;  %v3623_v15 = vld [vmem:[%s4579_s1 + $0x208] sm:$0xff]  }
  0x24   : > { %3253 = vmatprep.subr.bf16.mxu1 %v3567_v26  ;;  %v3617_v9 = vld [vmem:[%s4579_s1 + $0x238] sm:$0xff]   ;;  %v3620_v12 = vld [vmem:[%s4579_s1 + $0x220] sm:$0xff]   ;;  %v3622_v14 = vld [vmem:[%s4579_s1 + $0x210] sm:$0xff]  }
  0x25   : > { %3232 = vmatpush3.bf16.msra.mxu0 %v3566_v25  ;;  %v3621_v13 = vld [vmem:[%s4579_s1 + $0x218] sm:$0xff]   ;;  %v3624_v16 = vld [vmem:[%s4579_s1 + $0x200] sm:$0xff]   ;;  %vm4199_vm10 = vmneg %vm1361_vm9 }
  0x26   : > { %3233 = vmatprep.subr.bf16.mxu0 %v3569_v28  ;;  %v3625_v17 = vld [vmem:[%s3888_s23 + $0x20] ss:$36 sps:$4 sm:$0xff]   ;;  %s3743_s23 = smov 120  }
  0x27   : > { %3254 = vmatpush3.bf16.msra.mxu1 %v3568_v27 }
  0x28   : > { %3255 = vmatprep.subr.bf16.mxu1 %v3571_v30  ;;  %v2880_v30 = vld [vmem:[%s4583_s5] ss:$0 sm:$0xff] }
  0x29   : > { %3234 = vmatpush3.bf16.msra.mxu0 %v3570_v29 }
  0x2a   : > { %3263 = vmatprep.subr.bf16.mxu0 %v3576_v34 }
  0x2b   : > { %3256 = vmatpush3.bf16.msra.mxu1 %v3575_v33 }
  0x2c   : > { %964 = vmatmul.mubr.bf16.vlgmr.msra.gmra.mxu0 %v3572_v31  ;;  %3285 = vmatprep.subr.bf16.mxu1 %v3581_v38 }
  0x2d   : > { %3264 = vmatpush3.bf16.msra.mxu0 %v3580_v37  ;;  %1045 = vmatprep.mubr.bf16.mxu0 %v3612_v4 }
  0x2e   : > { %1005 = vmatmul.mubr.bf16.vlgmr.msra.gmra.mxu1 %v3577_v35  ;;  %3265 = vmatprep.subr.bf16.mxu0 %v3583_v40 }
  0x2f   : > { %3286 = vmatpush3.bf16.msra.mxu1 %v3582_v39  ;;  %1086 = vmatprep.mubr.bf16.mxu1 %v3616_v8  ;;  %v3742_v39 = vmov 1983009808  }
  0x30   : > { %3287 = vmatprep.subr.bf16.mxu1 %v3585_v42  ;;  %v1142_v40 = vunpack.c.l.s4 %v3742_v39 }
  0x31   : > { %3266 = vmatpush3.bf16.msra.mxu0 %v3584_v41 }
  0x32   : > { %3267 = vmatprep.subr.bf16.mxu0 %v3587_v44  ;;  %v1144_v44 = vlaneseq }
  0x33   : > { %3288 = vmatpush3.bf16.msra.mxu1 %v3586_v43 }
  0x34   : > { %3289 = vmatprep.subr.bf16.mxu1 %v3589_v46 }
  0x35   : > { %3268 = vmatpush3.bf16.msra.mxu0 %v3588_v45 }
  0x36   : > { %3269 = vmatprep.subr.bf16.mxu0 %v3591_v48 }
  0x37   : > { %3290 = vmatpush3.bf16.msra.mxu1 %v3590_v47 }
  0x38   : > { %3291 = vmatprep.subr.bf16.mxu1 %v3593_v50  ;;  %v1143_v50 = vunpack.c.0.s8 %v1142_v40 }
  0x39   : > { %3270 = vmatpush3.bf16.msra.mxu0 %v3592_v49 }
  0x3a   : > { %3271 = vmatprep.subr.bf16.mxu0 %v3595_v52 }
  0x3b   : > { %3292 = vmatpush3.bf16.msra.mxu1 %v3594_v51  ;;  %v4041_v51 = vshrl.u32 %v1144_v44, 7  ;;  %v3626_v44 = vld [vmem:[%s4580_s2 + $0x88] sm:$0xff]  }
  0x3c   : > { %3293 = vmatprep.subr.bf16.mxu1 %v3597_v54 }
  0x3d   : > { %3272 = vmatpush3.bf16.msra.mxu0 %v3596_v53 }
  0x3e   : > { %3273 = vmatprep.subr.bf16.mxu0 %v3599_v56 }
  0x3f   : > { %3294 = vmatpush3.bf16.msra.mxu1 %v3598_v55 }
  0x40   : > { %3295 = vmatprep.subr.bf16.mxu1 %v3601_v58 }
  0x41   : > { %3274 = vmatpush3.bf16.msra.mxu0 %v3600_v57  ;;  %v4044_v57 = vsub.s32 %v1143_v50, %v4041_v51  ;;  %v3632_v50 = vld [vmem:[%s4580_s2 + $0x28] sm:$0xff]  }
  0x42   : > { %3275 = vmatprep.subr.bf16.mxu0 %v3603_v60 }
  0x43   : > { %3296 = vmatpush3.bf16.msra.mxu1 %v3602_v59 }
  0x44   : > { %3297 = vmatprep.subr.bf16.mxu1 %v3605_v62 }
  0x45   : > { %3276 = vmatpush3.bf16.msra.mxu0 %v3604_v61 }
  0x46   : > { %3277 = vmatprep.subr.bf16.mxu0 %v3607_v0 }
  0x47   : > { %3298 = vmatpush3.bf16.msra.mxu1 %v3606_v63 }
  0x48   : > { %3299 = vmatprep.subr.bf16.mxu1 %v3609_v2 }
  0x49   : > { %3278 = vmatpush3.bf16.msra.mxu0 %v3608_v1 }
  0x4a   : > { %3405 = vmatprep.subr.bf16.mxu0 %v3740_v6 }
  0x4b   : > { %3300 = vmatpush3.bf16.msra.mxu1 %v3613_v5 }
  0x4c   : > { %1046 = vmatmul.mubr.bf16.vlgmr.msra.gmra.mxu0 %v3610_v3 }
  0x4d   : > { %3421 = vmatprep.mubr.msk.bf16.mxu0 %vm3741_vm0, %v3740_v6  ;;  %3406 = vmatpush3.bf16.msra.mxu0 %v3617_v9 }
  0x4e   : > { %1087 = vmatmul.mubr.bf16.vlgmr.msra.gmra.mxu1 %v3614_v7  ;;  %3407 = vmatprep.subr.bf16.mxu0 %v3740_v6  ;;  %v4049_v7 = vsub.s32 0, %v4041_v51 }
  0x51   : > { %3408 = vmatpush3.bf16.msra.mxu0 %v3618_v10 }
  0x52   : > { %3409 = vmatprep.subr.bf16.mxu0 %v3740_v6 }
  0x55   : > { %3410 = vmatpush3.bf16.msra.mxu0 %v3619_v11 }
  0x56   : > { %3411 = vmatprep.subr.bf16.mxu0 %v3740_v6 }
  0x59   : > { %3412 = vmatpush3.bf16.msra.mxu0 %v3620_v12 }
  0x5a   : > { %3413 = vmatprep.subr.bf16.mxu0 %v3740_v6 }
  0x5d   : > { %3414 = vmatpush3.bf16.msra.mxu0 %v3621_v13 }
  0x5e   : > { %3415 = vmatprep.subr.bf16.mxu0 %v3740_v6 }
  0x61   : > { %3416 = vmatpush3.bf16.msra.mxu0 %v3622_v14 }
  0x62   : > { %3417 = vmatprep.subr.bf16.mxu0 %v3740_v6 }
  0x65   : > { %3418 = vmatpush3.bf16.msra.mxu0 %v3623_v15 }
  0x66   : > { %3419 = vmatprep.subr.bf16.mxu0 %v3740_v6 }
  0x69   : > { %3420 = vmatpush3.bf16.msra.mxu0 %v3624_v16 }
  0x6c   : > { %3422 = vmatmul.mubr.bf16.vlgmr.msra.gmra.mxu0 %v3625_v17 }
  0xec   : > { %v3235_v18 = vpop.f32.mrf.mxu0 }
  0xee   : > { %v3236_v19 = vpop.f32.mrf.mxu0  ;;  %v3257_v20 = vpop.f32.mrf.mxu1 }
  0xef   : > { %v3237_v29 = vadd.f32 %v3236_v19, %v3235_v18 }
  0xf0   : > { %v3238_v21 = vpop.f32.mrf.mxu0  ;;  %v3258_v22 = vpop.f32.mrf.mxu1 }
  0xf1   : > { %v966_v33 = vadd.f32 %v3237_v29, %v2880_v30  ;;  %v3259_v34 = vadd.f32 %v3258_v22, %v3257_v20 }
  0xf2   : > { %v3239_v23 = vpop.f32.mrf.mxu0  ;;  %v3260_v24 = vpop.f32.mrf.mxu1 }
  0xf3   : > { %v3240_v35 = vadd.f32 %v3239_v23, %v3238_v21  ;;  %v1007_v41 = vadd.f32 %v3259_v34, %v966_v33 }
  0xf4   : > { %v3261_v26 = vpop.f32.mrf.mxu1 }
  0xf5   : > { %v969_v42 = vadd.f32 %v3240_v35, %v2880_v30  ;;  %v3262_v43 = vadd.f32 %v3261_v26, %v3260_v24 }
  0xf7   : > { %v1010_v49 = vadd.f32 %v3262_v43, %v969_v42 }
 0x10c   : > { %v3279_v25 = vpop.f32.mrf.mxu0 }
 0x10e   : > { %v3280_v27 = vpop.f32.mrf.mxu0  ;;  %v3301_v28 = vpop.f32.mrf.mxu1 }
 0x10f   : > { %v3281_v36 = vadd.f32 %v3280_v27, %v3279_v25 }
 0x110   : > { %v3282_v31 = vpop.f32.mrf.mxu0  ;;  %v3302_v32 = vpop.f32.mrf.mxu1 }
 0x111   : > { %v1048_v45 = vadd.f32 %v3281_v36, %v1007_v41  ;;  %v3303_v46 = vadd.f32 %v3302_v32, %v3301_v28 }
 0x112   : > { %v3283_v37 = vpop.f32.mrf.mxu0  ;;  %v3304_v38 = vpop.f32.mrf.mxu1 }
 0x113   : > { %v3284_v47 = vadd.f32 %v3283_v37, %v3282_v31  ;;  %v1089_v54 = vadd.f32 %v3303_v46, %v1048_v45  ;;  %v3628_v45 = vld [vmem:[%s4580_s2 + $0x38] sm:$0xff]   ;;  %v3744_v46 = vmov 0  }
 0x114   : > { %v3305_v48 = vpop.f32.mrf.mxu1  ;;  %1509 = vmatprep.subr.bf16.mxu1 %v3744_v46  ;;  %1612 = vmatprep.subr.bf16.mxu0 %v3744_v46 }
 0x115   : > { %v1051_v52 = vadd.f32 %v3284_v47, %v1010_v49  ;;  %v3306_v53 = vadd.f32 %v3305_v48, %v3304_v38  ;;  %1510 = vmatpush1.bf16.msra.mxu1 %v3626_v44  ;;  %v3627_v47 = vld [vmem:[%s4580_s2 + $0x80] sm:$0xff]   ;;  %1613 = vmatpush1.bf16.msra.mxu0 %v3628_v45  ;;  %v3630_v48 = vld [vmem:[%s4580_s2 + $0x30] sm:$0xff]   ;;  %v3629_v49 = vld [vmem:[%s4580_s2 + $0x78] sm:$0xff]  }
 0x116   : > { %1511 = vmatprep.subr.bf16.mxu1 %v3744_v46  ;;  %1614 = vmatprep.subr.bf16.mxu0 %v3744_v46 }
 0x117   : > { %v1092_v60 = vadd.f32 %v3306_v53, %v1051_v52  ;;  %v3631_v52 = vld [vmem:[%s4580_s2 + $0x70] sm:$0xff]   ;;  %v3634_v53 = vld [vmem:[%s4580_s2 + $0x20] sm:$0xff]  }
 0x119   : > { %1512 = vmatpush1.bf16.msra.mxu1 %v3627_v47  ;;  %1615 = vmatpush1.bf16.msra.mxu0 %v3630_v48 }
 0x11a   : > { %1513 = vmatprep.subr.bf16.mxu1 %v3744_v46  ;;  %1616 = vmatprep.subr.bf16.mxu0 %v3744_v46 }
 0x11d   : > { %1514 = vmatpush1.bf16.msra.mxu1 %v3629_v49  ;;  %1617 = vmatpush1.bf16.msra.mxu0 %v3632_v50  ;;  %v3645_v50 = vld [vmem:[%s4580_s2 + $0xd8] sm:$0xff]  }
 0x11e   : > { %1515 = vmatprep.subr.bf16.mxu1 %v3744_v46  ;;  %1618 = vmatprep.subr.bf16.mxu0 %v3744_v46 }
 0x121   : > { %1516 = vmatpush1.bf16.msra.mxu1 %v3631_v52  ;;  %1619 = vmatpush1.bf16.msra.mxu0 %v3634_v53 }
 0x122   : > { %1517 = vmatprep.subr.bf16.mxu1 %v3744_v46  ;;  %1620 = vmatprep.subr.bf16.mxu0 %v3744_v46 }
 0x12c   : > { %v1129_v55 = vpop.f32.mrf.mxu0 }
 0x12d   : > { %v1130_v56 = vadd.f32 %v1129_v55, %v1089_v54  ;;  %v3633_v54 = vld [vmem:[%s4580_s2 + $0x68] sm:$0xff]   ;;  %v3636_v55 = vld [vmem:[%s4580_s2 + $0x18] sm:$0xff]  }
 0x12e   : > { %v3423_v58 = vpop.f32.mrf.mxu0  ;;  %1518 = vmatpush1.bf16.msra.mxu1 %v3633_v54  ;;  %1621 = vmatpush1.bf16.msra.mxu0 %v3636_v55 }
 0x12f   : > { %v1136_v59 = vmax.f32 %v1130_v56, 0.0  ;;  %v3635_v56 = vld [vmem:[%s4580_s2 + $0x60] sm:$0xff]   ;;  %v3638_v58 = vld [vmem:[%s4580_s2 + $0x10] sm:$0xff]   ;;  %1519 = vmatprep.subr.bf16.mxu1 %v3744_v46  ;;  %1622 = vmatprep.subr.bf16.mxu0 %v3744_v46 }
 0x130   : > { %v1132_v61 = vpop.f32.mrf.mxu0 }
 0x131   : > { %v1140_v62 = vcombine.high %v1136_v59, %v1136_v59  ;;  %v1147_v63 = vrot.slane %v1136_v59, %v4044_v57  ;;  %v1133_v0 = vadd.f32 %v1132_v61, %v1092_v60  ;;  %v3637_v59 = vld [vmem:[%s4580_s2 + $0x58] sm:$0xff]   ;;  %v3640_v60 = vld [vmem:[%s4580_s2 + $0x8] sm:$0xff]   ;;  %v3639_v61 = vld [vmem:[%s4580_s2 + $0x50] sm:$0xff]  }
 0x132   : > { %v3424_v1 = vpop.f32.mrf.mxu0  ;;  %1520 = vmatpush1.bf16.msra.mxu1 %v3635_v56  ;;  %1623 = vmatpush1.bf16.msra.mxu0 %v3638_v58 }
 0x133   : > { %v1154_v2 = vrot.slane %v1140_v62, %v4044_v57  ;;  %v1155_v3 = vcombine.high %v1147_v63, %v1147_v63  ;;  %v2962_v4 = vrot.slane %v1147_v63, 9  ;;  %v1137_v5 = vmax.f32 %v1133_v0, 0.0  ;;  %1521 = vmatprep.subr.bf16.mxu1 %v3744_v46  ;;  %1624 = vmatprep.subr.bf16.mxu0 %v3744_v46  ;;  %v3642_v62 = vld [vmem:[%s4580_s2] sm:$0xff]  }
 0x135   : > { %v1156_v8 = vcombine.high %v1154_v2, %v1154_v2  ;;  %v2963_v9 = vrot.slane %v1155_v3, 9  ;;  %v2964_v10 = vrot.slane %v1154_v2, 9  ;;  %v4051_v11 = vmax.f32 %v1147_v63, %v2962_v4  ;;  %v3641_v63 = vld [vmem:[%s4580_s2 + $0x98] sm:$0xff]  }
 0x136   : > { %v1157_v12 = vcombine.high %v1137_v5, %v1137_v5  ;;  %v1164_v13 = vrot.slane %v1137_v5, %v4044_v57  ;;  %1522 = vmatpush1.bf16.msra.mxu1 %v3637_v59  ;;  %1625 = vmatpush1.bf16.msra.mxu0 %v3640_v60 }
 0x137   : > { %v2965_v14 = vrot.slane %v1156_v8, 9  ;;  %v4054_v15 = vmax.f32 %v1155_v3, %v2963_v9  ;;  %v4056_v16 = vmax.f32 %v1154_v2, %v2964_v10  ;;  %v1225_v21 = vrot.slane %v4051_v11, %v4049_v7  ;;  %1523 = vmatprep.subr.bf16.mxu1 %v3744_v46  ;;  %1626 = vmatprep.subr.bf16.mxu0 %v3744_v46  ;;  %v3643_v9 = vld [vmem:[%s4580_s2 + $0x90] sm:$0xff]  }
 0x138   : > { %v1171_v17 = vrot.slane %v1157_v12, %v4044_v57  ;;  %v1172_v18 = vcombine.high %v1164_v13, %v1164_v13  ;;  %v2966_v19 = vrot.slane %v1164_v13, 9  ;;  %v3644_v12 = vld [vmem:[%s4580_s2 + $0x48] sm:$0xff]  }
 0x139   : > { %v4059_v20 = vmax.f32 %v1156_v8, %v2965_v14  ;;  %v1229_v22 = vrot.slane %v4054_v15, %v4049_v7  ;;  %v1233_v23 = vrot.slane %v4056_v16, %v4049_v7 }
 0x13a   : > { %v2967_v24 = vrot.slane %v1172_v18, 9  ;;  %v2968_v25 = vrot.slane %v1171_v17, 9  ;;  %v4067_v26 = vmax.f32 %v1164_v13, %v2966_v19  ;;  %v1173_v27 = vcombine.high %v1171_v17, %v1171_v17  ;;  %1524 = vmatpush1.bf16.msra.mxu1 %v3639_v61  ;;  %1627 = vmatpush1.bf16.msra.mxu0 %v3642_v62  ;;  %v3647_v62 = vld [vmem:[%s4580_s2 + $0xd0] sm:$0xff]  }
 0x13b   : > { %v1237_v28 = vrot.slane %v4059_v20, %v4049_v7  ;;  %v1255_v29 = vsel %vm1254_vm1, %v1229_v22, %v1225_v21  ;;  %1537 = vmatprep.subr.bf16.mxu1 %v3744_v46  ;;  %1640 = vmatprep.subr.bf16.mxu0 %v3744_v46 }
 0x13c   : > { %v4072_v30 = vmax.f32 %v1172_v18, %v2967_v24  ;;  %v1241_v31 = vrot.slane %v4067_v26, %v4049_v7  ;;  %v2969_v32 = vrot.slane %v1173_v27, 9  ;;  %v4076_v33 = vmax.f32 %v1171_v17, %v2968_v25 }
 0x13d   : > { %v1257_v34 = vsel %vm1256_vm2, %v1233_v23, %v1255_v29 }
 0x13e   : > { %v4079_v35 = vmax.f32 %v1173_v27, %v2969_v32  ;;  %v1245_v36 = vrot.slane %v4072_v30, %v4049_v7  ;;  %v1249_v37 = vrot.slane %v4076_v33, %v4049_v7  ;;  %v1259_v38 = vsel %vm1258_vm3, %v1237_v28, %v1257_v34  ;;  %1538 = vmatpush2.bf16.msra.mxu1 %v3641_v63  ;;  %v3648_v63 = vld [vmem:[%s4580_s2 + $0xc8] sm:$0xff]  }
 0x13f   : > { %v1261_v39 = vsel %vm1260_vm4, %v1241_v31, %v1259_v38  ;;  %1539 = vmatprep.subr.bf16.mxu1 %v3744_v46  ;;  %1641 = vmatpush2.bf16.msra.mxu0 %v3644_v12 }
 0x140   : > { %v1253_v40 = vrot.slane %v4079_v35, %v4049_v7  ;;  %v1263_v41 = vsel %vm1262_vm5, %v1245_v36, %v1261_v39  ;;  %1642 = vmatprep.subr.bf16.mxu0 %v3744_v46  ;;  %v1379_v39 = vand.u32 7, %v4041_v51 }
 0x141   : > { %v1265_v42 = vsel %vm1264_vm6, %v1249_v37, %v1263_v41 }
 0x142   : > { %v1267_v43 = vsel %vm1266_vm7, %v1253_v40, %v1265_v42  ;;  %1540 = vmatpush2.bf16.msra.mxu1 %v3643_v9  ;;  %vm4203_vm13 = vcmp.eq.s32.totalorder %v1379_v39, 0  ;;  %vm4207_vm14 = vcmp.eq.s32.totalorder %v1379_v39, 7  ;;  %v3655_v9 = vld [vmem:[%s4580_s2 + $0xe0] sm:$0xff]  }
 0x143   : > { %1268 = vrot.lane.b32.xlu0 %v1267_v43, %s3743_s23  ;;  %1738 = vmatprep.subr.bf16.mxu1 %v3744_v46  ;;  %v3058_v43 = vld [vmem:[%s4583_s5 + $0x1] ss:$0 sm:$0xff] }
 0x1b5   : > { %v1269_v0 = vpop.permute.xlu0 %1268 }
 0x1b6   : > { %v1272_v1 = vsel %vm1271_vm8, %v1269_v0, 0.0  ;;  %v3649_v0 = vld [vmem:[%s4580_s2 + $0xc0] sm:$0xff]  }
 0x1b7   : > { %v1274_v2 = vcombine.high %v1272_v1, %v1272_v1  ;;  %v1281_v3 = vrot.slane %v1272_v1, %v4044_v57  ;;  %v3650_v1 = vld [vmem:[%s4580_s2 + $0xb8] sm:$0xff]  }
 0x1b9   : > { %v1288_v4 = vrot.slane %v1274_v2, %v4044_v57  ;;  %v1289_v5 = vcombine.high %v1281_v3, %v1281_v3  ;;  %v1291_v8 = vrot.slane %v1281_v3, 1  ;;  %v1303_v10 = vmax.f32 %v4051_v11, %v1281_v3  ;;  %v3651_v2 = vld [vmem:[%s4580_s2 + $0xb0] sm:$0xff]   ;;  %v3652_v3 = vld [vmem:[%s4580_s2 + $0xa8] sm:$0xff]  }
 0x1bb   : > { %v1290_v13 = vcombine.high %v1288_v4, %v1288_v4  ;;  %v1292_v14 = vrot.slane %v1289_v5, 1  ;;  %v1293_v17 = vrot.slane %v1288_v4, 1  ;;  %v1304_v18 = vmax.f32 %v4054_v15, %v1291_v8 }
 0x1bc   : > { %v1305_v19 = vmax.f32 %v4056_v16, %v1289_v5  ;;  %v1307_v11 = vmax.f32 %v4067_v26, %v1288_v4  ;;  %v1322_v24 = vrot.slane %v1303_v10, %v4049_v7  ;;  %v3653_v4 = vld [vmem:[%s4580_s2 + $0xa0] sm:$0xff]   ;;  %v3654_v5 = vld [vmem:[%s4580_s2 + $0xe8] sm:$0xff]  }
 0x1bd   : > { %v1294_v21 = vrot.slane %v1290_v13, 1  ;;  %v1306_v22 = vmax.f32 %v4059_v20, %v1292_v14  ;;  %v1308_v23 = vmax.f32 %v4072_v30, %v1293_v17  ;;  %v1326_v25 = vrot.slane %v1304_v18, %v4049_v7  ;;  %v3646_v20 = vld [vmem:[%s4580_s2 + $0x40] sm:$0xff]   ;;  %v3657_v14 = vld [vmem:[%s4581_s3 + $0x38] sm:$0xff]   ;;  %v3660_v18 = vld [vmem:[%s4581_s3 + $0x70] sm:$0xff]  }
 0x1be   : > { %v1330_v15 = vrot.slane %v1305_v19, %v4049_v7  ;;  %v1309_v16 = vmax.f32 %v4076_v33, %v1290_v13  ;;  %v1338_v29 = vrot.slane %v1307_v11, %v4049_v7  ;;  %1643 = vmatpush2.bf16.msra.mxu0 %v3646_v20  ;;  %v3656_v13 = vld [vmem:[%s4581_s3 + $0x78] sm:$0xff]   ;;  %v3662_v19 = vld [vmem:[%s4581_s3 + $0xf0] sm:$0xff]   ;;  %v3664_v11 = vld [vmem:[%s4581_s3 + $0x68] sm:$0xff]  }
 0x1bf   : > { %v1334_v27 = vrot.slane %v1306_v22, %v4049_v7  ;;  %v1351_v26 = vsel %vm1254_vm1, %v1326_v25, %v1322_v24  ;;  %v1310_v28 = vmax.f32 %v4079_v35, %v1294_v21  ;;  %v1342_v31 = vrot.slane %v1308_v23, %v4049_v7  ;;  %v3659_v17 = vld [vmem:[%s4581_s3 + $0xb8] sm:$0xff]   ;;  %3316 = vmatprep.subr.bf16.mxu0 %v3656_v13  ;;  %v3661_v21 = vld [vmem:[%s4581_s3 + $0x30] sm:$0xff]   ;;  %v3666_v23 = vld [vmem:[%s4581_s3 + $0xe8] sm:$0xff]  }
 0x1c0   : > { %v1352_v30 = vsel %vm1256_vm2, %v1330_v15, %v1351_v26  ;;  %v1346_v33 = vrot.slane %v1309_v16, %v4049_v7  ;;  %v3663_v22 = vld [vmem:[%s4581_s3 + $0xb0] sm:$0xff]   ;;  %v3665_v24 = vld [vmem:[%s4581_s3 + $0x28] sm:$0xff]   ;;  %v3668_v15 = vld [vmem:[%s4581_s3 + $0x60] sm:$0xff]  }
 0x1c1   : > { %v1353_v32 = vsel %vm1258_vm3, %v1334_v27, %v1352_v30  ;;  %v1350_v36 = vrot.slane %v1310_v28, %v4049_v7  ;;  %v3667_v25 = vld [vmem:[%s4581_s3 + $0xa8] sm:$0xff]   ;;  %v3670_v16 = vld [vmem:[%s4581_s3 + $0xe0] sm:$0xff]   ;;  %v3672_v26 = vld [vmem:[%s4581_s3 + $0x58] sm:$0xff]  }
 0x1c2   : > { %v1354_v34 = vsel %vm1260_vm4, %v1338_v29, %v1353_v32  ;;  %vm3003_vm4 = vmpackc.low %vm4199_vm10, %vm4199_vm10  ;;  %v3669_v27 = vld [vmem:[%s4581_s3 + $0x20] sm:$0xff]   ;;  %v3674_v28 = vld [vmem:[%s4581_s3 + $0xd8] sm:$0xff]  }
 0x1c3   : > { %v1355_v37 = vsel %vm1262_vm5, %v1342_v31, %v1354_v34  ;;  %vm3017_vm5 = vmneg %vm4203_vm13  ;;  %v3671_v20 = vld [vmem:[%s4581_s3 + $0xa0] sm:$0xff]   ;;  %v3673_v29 = vld [vmem:[%s4581_s3 + $0x18] sm:$0xff]  }
 0x1c4   : > { %v1356_v38 = vsel %vm1264_vm6, %v1346_v33, %v1355_v37  ;;  %vm3019_vm6 = vmpackc.low %vm3017_vm5, %vm3017_vm5  ;;  %v3675_v30 = vld [vmem:[%s4581_s3 + $0x98] sm:$0xff]   ;;  %v3676_v31 = vld [vmem:[%s4581_s3 + $0x50] sm:$0xff]  }
 0x1c5   : > { %v1357_v35 = vsel %vm1266_vm7, %v1350_v36, %v1356_v38  ;;  %vm3053_vm7 = vmneg %vm4207_vm14  ;;  %v3677_v32 = vld [vmem:[%s4581_s3 + $0x10] sm:$0xff]   ;;  %v3687_v13 = vld [vmem:[%s4581_s3 + $0x80] sm:$0xff]  }
 0x1c6   : > { %1358 = vrot.lane.b32.xlu0 %v1357_v35, %s3745_s11  ;;  %vm3055_vm8 = vmpackc.low %vm3053_vm7, %vm3053_vm7 }
 0x238   : > { %v1359_v41 = vpop.permute.xlu0 %1358 }
 0x239   : > { %v1362_v44 = vsel %vm1361_vm9, 0.0, %v1359_v41  ;;  %v1363_v45 = vsel %vm1361_vm9, %v1359_v41, 0.0  ;;  %v3004_v55 = vpack.c.bf16 %v1359_v41, %v1359_v41  ;;  %vm1850_vm9 = vcmask 916480  }
 0x23a   : > { %v1368_v47 = vrot.slane %v1362_v44, 7  ;;  %v1369_v51 = vrot.slane %v1363_v45, 7  ;;  %v1391_v48 = vrot.slane %v1363_v45, 1  ;;  %v1423_v49 = vpack.c.bf16 %v1363_v45, %v1363_v45 }
 0x23b   : > { %v1390_v8 = vrot.slane %v1362_v44, 1 }
 0x23c   : > { %v1373_v52 = vsel %vm1372_vm11, 0.0, %v1368_v47  ;;  %v1374_v53 = vsel %vm1372_vm11, 0.0, %v1369_v51  ;;  %v1396_v54 = vsel %vm1394_vm12, %v1391_v48, 0.0  ;;  %3000 = vmatprep.mubr.msk.bf16.mxu1 %vm1505_vm15, %v1423_v49  ;;  %v3678_v49 = vld [vmem:[%s4581_s3 + $0xd0] sm:$0xff]  }
 0x23d   : > { %v1389_v56 = vsel %vm4203_vm13, 0.0, %v1374_v53  ;;  %v1399_v58 = vsel %vm4207_vm14, 0.0, %v1396_v54  ;;  %3005 = vmatmul.mubr.msk.bf16.vlgmr.msra.gmra.mxu1 %vm3003_vm4, %v3004_v55  ;;  %v3020_v61 = vpack.c.bf16 %v1373_v52, %v1373_v52  ;;  %v1395_v10 = vsel %vm1394_vm12, %v1390_v8, 0.0  ;;  %v3679_v52 = vld [vmem:[%s4581_s3 + $0x90] sm:$0xff]   ;;  %v3680_v55 = vld [vmem:[%s4581_s3 + $0x48] sm:$0xff]  }
 0x23e   : > { %v1401_v59 = vpack.c.bf16 %v1389_v56, %v1389_v56  ;;  %v1653_v60 = vpack.c.bf16 %v1399_v58, %v1399_v58  ;;  %1739 = vmatpush1.bf16.msra.mxu1 %v3645_v50  ;;  %v3056_v12 = vpack.c.bf16 %v1395_v10, %v1395_v10  ;;  %v3681_v56 = vld [vmem:[%s4581_s3 + $0x8] sm:$0xff]   ;;  %v3686_v10 = vld [vmem:[%s4581_s3 + $0xc0] sm:$0xff]  }
 0x23f   : > { %1740 = vmatprep.subr.bf16.mxu1 %v3744_v46 }
 0x240   : > { %3016 = vmatprep.mubr.msk.bf16.mxu0 %vm1505_vm15, %v1401_v59  ;;  %3052 = vmatprep.mubr.msk.bf16.mxu1 %vm1505_vm15, %v1653_v60 }
 0x241   : > { %3021 = vmatmul.mubr.msk.bf16.vlgmr.msra.gmra.mxu0 %vm3019_vm6, %v3020_v61  ;;  %v3682_v61 = vld [vmem:[%s4581_s3 + $0xc8] sm:$0xff]  }
 0x242   : > { %1741 = vmatpush1.bf16.msra.mxu1 %v3647_v62  ;;  %3317 = vmatpush3.bf16.msra.mxu0 %v3657_v14  ;;  %v3683_v62 = vld [vmem:[%s4581_s3 + $0x88] sm:$0xff]  }
 0x243   : > { %1742 = vmatprep.subr.bf16.mxu1 %v3744_v46  ;;  %3318 = vmatprep.subr.bf16.mxu0 %v3660_v18 }
 0x246   : > { %1743 = vmatpush1.bf16.msra.mxu1 %v3648_v63  ;;  %3319 = vmatpush3.bf16.msra.mxu0 %v3661_v21 }
 0x247   : > { %1744 = vmatprep.subr.bf16.mxu1 %v3744_v46  ;;  %3320 = vmatprep.subr.bf16.mxu0 %v3664_v11 }
 0x24a   : > { %1745 = vmatpush1.bf16.msra.mxu1 %v3649_v0  ;;  %3321 = vmatpush3.bf16.msra.mxu0 %v3665_v24 }
 0x24b   : > { %1746 = vmatprep.subr.bf16.mxu1 %v3744_v46  ;;  %3322 = vmatprep.subr.bf16.mxu0 %v3668_v15 }
 0x24e   : > { %1747 = vmatpush1.bf16.msra.mxu1 %v3650_v1  ;;  %3323 = vmatpush3.bf16.msra.mxu0 %v3669_v27 }
 0x24f   : > { %1748 = vmatprep.subr.bf16.mxu1 %v3744_v46  ;;  %3324 = vmatprep.subr.bf16.mxu0 %v3672_v26 }
 0x252   : > { %1749 = vmatpush1.bf16.msra.mxu1 %v3651_v2  ;;  %3325 = vmatpush3.bf16.msra.mxu0 %v3673_v29  ;;  %v3688_v29 = vld [vmem:[%s4582_s4 + $0x38] sm:$0xff]  }
 0x253   : > { %1750 = vmatprep.subr.bf16.mxu1 %v3744_v46  ;;  %3326 = vmatprep.subr.bf16.mxu0 %v3676_v31 }
 0x256   : > { %1751 = vmatpush1.bf16.msra.mxu1 %v3652_v3  ;;  %3327 = vmatpush3.bf16.msra.mxu0 %v3677_v32  ;;  %v3684_v3 = vld [vmem:[%s4581_s3 + $0x40] sm:$0xff]  }
 0x257   : > { %1752 = vmatprep.subr.bf16.mxu1 %v3744_v46  ;;  %3328 = vmatprep.subr.bf16.mxu0 %v3680_v55 }
 0x25a   : > { %1753 = vmatpush1.bf16.msra.mxu1 %v3653_v4  ;;  %3329 = vmatpush3.bf16.msra.mxu0 %v3681_v56  ;;  %v3685_v4 = vld [vmem:[%s4581_s3] sm:$0xff]  }
 0x25b   : > { %1766 = vmatprep.subr.bf16.mxu1 %v3744_v46  ;;  %3330 = vmatprep.subr.bf16.mxu0 %v3684_v3  ;;  %v3707_v3 = vld [vmem:[%s4582_s4 + $0xa0] sm:$0xff]  }
 0x25e   : > { %1767 = vmatpush2.bf16.msra.mxu1 %v3654_v5  ;;  %3331 = vmatpush3.bf16.msra.mxu0 %v3685_v4  ;;  %v3708_v4 = vld [vmem:[%s4582_s4 + $0x98] sm:$0xff]  }
 0x25f   : > { %1768 = vmatprep.subr.bf16.mxu1 %v3744_v46  ;;  %v3658_v46 = vld [vmem:[%s4581_s3 + $0xf8] sm:$0xff]   ;;  %3425 = vmatprep.subr.bf16.mxu0 %v3740_v6 }
 0x262   : > { %1769 = vmatpush2.bf16.msra.mxu1 %v3655_v9 }
 0x263   : > { %3338 = vmatprep.subr.bf16.mxu1 %v3658_v46 }
 0x265   : > { %3057 = vmatmul.mubr.msk.bf16.vlgmr.msra.gmra.mxu1 %vm3055_vm8, %v3056_v12 }
 0x266   : > { %3339 = vmatpush3.bf16.msra.mxu1 %v3659_v17 }
 0x267   : > { %3340 = vmatprep.subr.bf16.mxu1 %v3662_v19 }
 0x26a   : > { %3341 = vmatpush3.bf16.msra.mxu1 %v3663_v22 }
 0x26b   : > { %3342 = vmatprep.subr.bf16.mxu1 %v3666_v23 }
 0x26e   : > { %3343 = vmatpush3.bf16.msra.mxu1 %v3667_v25 }
 0x26f   : > { %3344 = vmatprep.subr.bf16.mxu1 %v3670_v16 }
 0x272   : > { %3345 = vmatpush3.bf16.msra.mxu1 %v3671_v20 }
 0x273   : > { %3346 = vmatprep.subr.bf16.mxu1 %v3674_v28 }
 0x276   : > { %3347 = vmatpush3.bf16.msra.mxu1 %v3675_v30 }
 0x277   : > { %3348 = vmatprep.subr.bf16.mxu1 %v3678_v49 }
 0x27a   : > { %3349 = vmatpush3.bf16.msra.mxu1 %v3679_v52 }
 0x27b   : > { %3350 = vmatprep.subr.bf16.mxu1 %v3682_v61 }
 0x27e   : > { %3351 = vmatpush3.bf16.msra.mxu1 %v3683_v62  ;;  %v3702_v62 = vld [vmem:[%s4582_s4 + $0x48] sm:$0xff]  }
 0x27f   : > { %3352 = vmatprep.subr.bf16.mxu1 %v3686_v10 }
 0x282   : > { %3353 = vmatpush3.bf16.msra.mxu1 %v3687_v13 }
 0x283   : > { %3445 = vmatprep.subr.bf16.mxu1 %v3740_v6 }
 0x2fd   : > { %v1543_v33 = vpop.f32.mrf.mxu1 }
 0x2ff   : > { %v1545_v34 = vpop.f32.mrf.mxu1 }
 0x300   : > { %v3691_v34 = vld [vmem:[%s4582_s4 + $0x20] sm:$0xff]  }
 0x301   : > { %v1646_v36 = vpop.f32.mrf.mxu0  ;;  %v1546_v37 = vpop.f32.mrf.mxu1 }
 0x302   : > { %v1647_v41 = vadd.f32 %v1646_v36, %v1543_v33  ;;  %v3690_v33 = vld [vmem:[%s4582_s4 + $0x28] sm:$0xff]   ;;  %v3692_v36 = vld [vmem:[%s4582_s4 + $0x18] sm:$0xff]   ;;  %v3693_v37 = vld [vmem:[%s4582_s4 + $0x10] sm:$0xff]  }
 0x303   : > { %v1648_v38 = vpop.f32.mrf.mxu0  ;;  %v1547_v35 = vpop.f32.mrf.mxu1 }
 0x304   : > { %v3694_v38 = vld [vmem:[%s4582_s4 + $0x8] sm:$0xff]   ;;  %v3695_v35 = vld [vmem:[%s4582_s4] sm:$0xff]  }
 0x305   : > { %v1649_v39 = vpop.f32.mrf.mxu0 }
 0x306   : > { %v3696_v39 = vld [vmem:[%s4582_s4 + $0x78] sm:$0xff]  }
 0x307   : > { %v1650_v40 = vpop.f32.mrf.mxu0 }
 0x308   : > { %v3697_v40 = vld [vmem:[%s4582_s4 + $0x70] sm:$0xff]  }
 0x325   : > { %v1772_v42 = vpop.f32.mrf.mxu1 }
 0x326   : > { %v1778_v44 = vadd.f32 %v1772_v42, %v1647_v41  ;;  %v3698_v41 = vld [vmem:[%s4582_s4 + $0x68] sm:$0xff]   ;;  %v3699_v42 = vld [vmem:[%s4582_s4 + $0x60] sm:$0xff]  }
 0x327   : > { %v1774_v45 = vpop.f32.mrf.mxu1 }
 0x328   : > { %v1784_v47 = vadd.f32 %v3058_v43, %v1778_v44  ;;  %v3700_v43 = vld [vmem:[%s4582_s4 + $0x58] sm:$0xff]   ;;  %v3701_v44 = vld [vmem:[%s4582_s4 + $0x50] sm:$0xff]  }
 0x329   : > { %v1775_v51 = vpop.f32.mrf.mxu1 }
 0x32a   : > { %v1785_v48 = vmax.f32 %v1784_v47, 0.0  ;;  %v3063_v47 = vld [vmem:[%s4583_s5 + $0x2] ss:$0 sm:$0xff] }
 0x32b   : > { %v1776_v50 = vpop.f32.mrf.mxu1 }
 0x32c   : > { %v1787_v53 = vcombine.high %v1785_v48, %v1785_v48  ;;  %v1794_v54 = vrot.slane %v1785_v48, %v4044_v57 }
 0x32e   : > { %v1801_v58 = vrot.slane %v1787_v53, %v4044_v57  ;;  %v1802_v59 = vcombine.high %v1794_v54, %v1794_v54  ;;  %v3059_v60 = vrot.slane %v1794_v54, 9 }
 0x330   : > { %v3060_v63 = vrot.slane %v1802_v59, 9  ;;  %v1820_v0 = vmax.f32 %v1794_v54, %v3059_v60  ;;  %v1803_v1 = vcombine.high %v1801_v58, %v1801_v58  ;;  %v3061_v2 = vrot.slane %v1801_v58, 9 }
 0x332   : > { %v3062_v5 = vrot.slane %v1803_v1, 9  ;;  %v1821_v8 = vmax.f32 %v1802_v59, %v3060_v63  ;;  %v1822_v9 = vmax.f32 %v1801_v58, %v3061_v2  ;;  %v1831_v12 = vrot.slane %v1820_v0, %v4049_v7  ;;  %v3703_v63 = vld [vmem:[%s4582_s4 + $0x40] sm:$0xff]   ;;  %v3706_v2 = vld [vmem:[%s4582_s4 + $0xa8] sm:$0xff]  }
 0x334   : > { %v1823_v14 = vmax.f32 %v1803_v1, %v3062_v5  ;;  %v1835_v46 = vrot.slane %v1821_v8, %v4049_v7  ;;  %v1839_v17 = vrot.slane %v1822_v9, %v4049_v7  ;;  %v3705_v1 = vld [vmem:[%s4582_s4 + $0xb0] sm:$0xff]  }
 0x335   : > { %v3709_v5 = vld [vmem:[%s4582_s4 + $0x90] sm:$0xff]  }
 0x336   : > { %v1843_v18 = vrot.slane %v1823_v14, %v4049_v7  ;;  %v1844_v19 = vsel %vm1254_vm1, %v1835_v46, %v1831_v12  ;;  %vm3096_vm1 = vmpackc.low %vm1372_vm11, %vm1372_vm11 }
 0x337   : > { %v1845_v21 = vsel %vm1256_vm2, %v1839_v17, %v1844_v19  ;;  %v3711_v19 = vld [vmem:[%s4582_s4 + $0x80] sm:$0xff]  }
 0x338   : > { %v1846_v22 = vsel %vm1258_vm3, %v1843_v18, %v1845_v21  ;;  %v3710_v18 = vld [vmem:[%s4582_s4 + $0x88] sm:$0xff]   ;;  %v3712_v21 = vld [vmem:[%s4582_s4 + $0xf8] sm:$0xff]  }
 0x339   : > { %1847 = vrot.lane.b32.xlu1 %v1846_v22, %s3746_s13  ;;  %v3713_v22 = vld [vmem:[%s4582_s4 + $0xf0] sm:$0xff]  }
 0x3ab   : > { %v1848_v11 = vpop.permute.xlu1 %1847 }
 0x3ac   : > { %v1851_v23 = vsel %vm1850_vm9, %v1848_v11, 0.0  ;;  %v3714_v11 = vld [vmem:[%s4582_s4 + $0xe8] sm:$0xff]  }
 0x3ad   : > { %v1859_v24 = vrot.slane %v1851_v23, %v4044_v57  ;;  %v3689_v57 = vld [vmem:[%s4582_s4 + $0x30] sm:$0xff]   ;;  %v3715_v23 = vld [vmem:[%s4582_s4 + $0xe0] sm:$0xff]  }
 0x3af   : > { %v1860_v25 = vcombine.high %v1859_v24, %v1859_v24  ;;  %v1861_v15 = vrot.slane %v1859_v24, 1  ;;  %v1867_v16 = vmax.f32 %v1820_v0, %v1859_v24  ;;  %v3704_v0 = vld [vmem:[%s4582_s4 + $0xb8] sm:$0xff]  }
 0x3b0   : > { %v3716_v24 = vld [vmem:[%s4582_s4 + $0xd8] sm:$0xff]  }
 0x3b1   : > { %v1862_v27 = vrot.slane %v1860_v25, 1  ;;  %v1868_v7 = vmax.f32 %v1821_v8, %v1861_v15  ;;  %v1869_v20 = vmax.f32 %v1822_v9, %v1860_v25  ;;  %v3100_v30 = vpack.c.bf16 %v1867_v16, %v1867_v16  ;;  %v3108_v8 = vld [vmem:[%s4583_s5 + $0x3] ss:$0 sm:$0xff]  ;;  %v3717_v25 = vld [vmem:[%s4582_s4 + $0xd0] sm:$0xff]   ;;  %v3133_v15 = vld [vmem:[%s4583_s5 + $0x4] ss:$0 sm:$0xff] }
 0x3b3   : > { %v3097_v26 = vpack.c.bf16 %v1868_v7, %v1868_v7  ;;  %v1870_v28 = vmax.f32 %v1823_v14, %v1862_v27  ;;  %v3106_v32 = vpack.c.bf16 %v1869_v20, %v1869_v20 }
 0x3b5   : > { %3098 = vmatprep.mubr.msk.bf16.mxu0 %vm3096_vm1, %v3097_v26  ;;  %v3103_v31 = vpack.c.bf16 %v1870_v28, %v1870_v28 }
 0x3b6   : > { %3101 = vmatmul.mubr.msk.bf16.vlgmr.msra.gmra.mxu0 %vm3096_vm1, %v3100_v30  ;;  %v3718_v30 = vld [vmem:[%s4582_s4 + $0xc8] sm:$0xff]  }
 0x3b7   : > { %3104 = vmatprep.mubr.msk.bf16.mxu1 %vm3096_vm1, %v3103_v31  ;;  %3426 = vmatpush3.bf16.msra.mxu0 %v3688_v29  ;;  %v3719_v31 = vld [vmem:[%s4582_s4 + $0xc0] sm:$0xff]  }
 0x3b8   : > { %3107 = vmatmul.mubr.msk.bf16.vlgmr.msra.gmra.mxu1 %vm3096_vm1, %v3106_v32  ;;  %3427 = vmatprep.subr.bf16.mxu0 %v3740_v6  ;;  %v3720_v32 = vld [vmem:[%s4582_s4 + $0x138] sm:$0xff]  }
 0x3b9   : > { %3441 = vmatprep.mubr.msk.bf16.mxu0 %vm3741_vm0, %v3740_v6  ;;  %3461 = vmatprep.mubr.msk.bf16.mxu1 %vm3741_vm0, %v3740_v6 }
 0x3ba   : > { %3446 = vmatpush3.bf16.msra.mxu1 %v3696_v39 }
 0x3bb   : > { %3428 = vmatpush3.bf16.msra.mxu0 %v3689_v57  ;;  %3447 = vmatprep.subr.bf16.mxu1 %v3740_v6  ;;  %v3721_v57 = vld [vmem:[%s4582_s4 + $0x130] sm:$0xff]  }
 0x3bc   : > { %3429 = vmatprep.subr.bf16.mxu0 %v3740_v6 }
 0x3be   : > { %3448 = vmatpush3.bf16.msra.mxu1 %v3697_v40 }
 0x3bf   : > { %3430 = vmatpush3.bf16.msra.mxu0 %v3690_v33  ;;  %3449 = vmatprep.subr.bf16.mxu1 %v3740_v6  ;;  %v3722_v33 = vld [vmem:[%s4582_s4 + $0x128] sm:$0xff]  }
 0x3c0   : > { %3431 = vmatprep.subr.bf16.mxu0 %v3740_v6 }
 0x3c2   : > { %3450 = vmatpush3.bf16.msra.mxu1 %v3698_v41 }
 0x3c3   : > { %3432 = vmatpush3.bf16.msra.mxu0 %v3691_v34  ;;  %3451 = vmatprep.subr.bf16.mxu1 %v3740_v6  ;;  %v3158_v34 = vld [vmem:[%s4583_s5 + $0x5] ss:$0 sm:$0xff] }
 0x3c4   : > { %3433 = vmatprep.subr.bf16.mxu0 %v3740_v6 }
 0x3c6   : > { %3452 = vmatpush3.bf16.msra.mxu1 %v3699_v42  ;;  %v3723_v42 = vld [vmem:[%s4582_s4 + $0x120] sm:$0xff]  }
 0x3c7   : > { %3434 = vmatpush3.bf16.msra.mxu0 %v3692_v36  ;;  %3453 = vmatprep.subr.bf16.mxu1 %v3740_v6 }
 0x3c8   : > { %3435 = vmatprep.subr.bf16.mxu0 %v3740_v6 }
 0x3ca   : > { %3454 = vmatpush3.bf16.msra.mxu1 %v3700_v43  ;;  %v3724_v43 = vld [vmem:[%s4582_s4 + $0x118] sm:$0xff]  }
 0x3cb   : > { %3436 = vmatpush3.bf16.msra.mxu0 %v3693_v37  ;;  %3455 = vmatprep.subr.bf16.mxu1 %v3740_v6 }
 0x3cc   : > { %3437 = vmatprep.subr.bf16.mxu0 %v3740_v6 }
 0x3ce   : > { %3456 = vmatpush3.bf16.msra.mxu1 %v3701_v44  ;;  %v3725_v44 = vld [vmem:[%s4582_s4 + $0x110] sm:$0xff]  }
 0x3cf   : > { %3438 = vmatpush3.bf16.msra.mxu0 %v3694_v38  ;;  %3457 = vmatprep.subr.bf16.mxu1 %v3740_v6 }
 0x3d0   : > { %3439 = vmatprep.subr.bf16.mxu0 %v3740_v6 }
 0x3d2   : > { %3458 = vmatpush3.bf16.msra.mxu1 %v3702_v62 }
 0x3d3   : > { %3440 = vmatpush3.bf16.msra.mxu0 %v3695_v35  ;;  %3459 = vmatprep.subr.bf16.mxu1 %v3740_v6 }
 0x3d4   : > { %3465 = vmatprep.subr.bf16.mxu0 %v3740_v6 }
 0x3d6   : > { %3460 = vmatpush3.bf16.msra.mxu1 %v3703_v63 }
 0x3d7   : > { %3485 = vmatprep.subr.bf16.mxu1 %v3740_v6 }
 0x476   : > { %v3332_v45 = vpop.f32.mrf.mxu0 }
 0x478   : > { %v3333_v51 = vpop.f32.mrf.mxu0  ;;  %v3354_v48 = vpop.f32.mrf.mxu1 }
 0x479   : > { %v3334_v49 = vadd.f32 %v3333_v51, %v3332_v45  ;;  %v3726_v45 = vld [vmem:[%s4582_s4 + $0x108] sm:$0xff]   ;;  %v3183_v51 = vld [vmem:[%s4583_s5 + $0x6] ss:$0 sm:$0xff] }
 0x47a   : > { %v3335_v50 = vpop.f32.mrf.mxu0  ;;  %v3355_v52 = vpop.f32.mrf.mxu1 }
 0x47b   : > { %v2175_v53 = vadd.f32 %v3334_v49, %v3063_v47  ;;  %v3356_v54 = vadd.f32 %v3355_v52, %v3354_v48  ;;  %v3727_v47 = vld [vmem:[%s4582_s4 + $0x100] sm:$0xff]  }
 0x47c   : > { %v3336_v55 = vpop.f32.mrf.mxu0  ;;  %v3357_v56 = vpop.f32.mrf.mxu1 }
 0x47d   : > { %v2215_v58 = vadd.f32 %v3356_v54, %v2175_v53 }
 0x47e   : > { %v3358_v59 = vpop.f32.mrf.mxu1 }
 0x47f   : > { %v2220_v60 = vmax.f32 %v2215_v58, 0.0 }
 0x481   : > { %v2221_v61 = vpack.c.bf16 %v2220_v60, %v2220_v60 }
 0x483   : > { %3442 = vmatmul.mubr.bf16.vlgmr.msra.gmra.mxu0 %v2221_v61  ;;  %v3208_v61 = vld [vmem:[%s4583_s5 + $0x7] ss:$0 sm:$0xff] }
 0x484   : > { %3481 = vmatprep.mubr.msk.bf16.mxu0 %vm3741_vm0, %v3740_v6  ;;  %3466 = vmatpush3.bf16.msra.mxu0 %v3704_v0 }
 0x485   : > { %3467 = vmatprep.subr.bf16.mxu0 %v3740_v6 }
 0x488   : > { %3468 = vmatpush3.bf16.msra.mxu0 %v3705_v1 }
 0x489   : > { %3469 = vmatprep.subr.bf16.mxu0 %v3740_v6 }
 0x48c   : > { %3470 = vmatpush3.bf16.msra.mxu0 %v3706_v2 }
 0x48d   : > { %3471 = vmatprep.subr.bf16.mxu0 %v3740_v6 }
 0x490   : > { %3472 = vmatpush3.bf16.msra.mxu0 %v3707_v3 }
 0x491   : > { %3473 = vmatprep.subr.bf16.mxu0 %v3740_v6 }
 0x494   : > { %3474 = vmatpush3.bf16.msra.mxu0 %v3708_v4 }
 0x495   : > { %3475 = vmatprep.subr.bf16.mxu0 %v3740_v6 }
 0x498   : > { %3476 = vmatpush3.bf16.msra.mxu0 %v3709_v5 }
 0x499   : > { %3477 = vmatprep.subr.bf16.mxu0 %v3740_v6 }
 0x49c   : > { %3478 = vmatpush3.bf16.msra.mxu0 %v3710_v18 }
 0x49d   : > { %3479 = vmatprep.subr.bf16.mxu0 %v3740_v6 }
 0x4a0   : > { %3480 = vmatpush3.bf16.msra.mxu0 %v3711_v19 }
 0x4a1   : > { %3505 = vmatprep.subr.bf16.mxu0 %v3740_v6 }
 0x543   : > { %v2325_v9 = vpop.f32.mrf.mxu0 }
 0x544   : > { %v2326_v10 = vadd.f32 %v3108_v8, %v2325_v9 }
 0x545   : > { %v3443_v12 = vpop.f32.mrf.mxu0 }
 0x546   : > { %v2331_v13 = vmax.f32 %v2326_v10, 0.0 }
 0x547   : > { %v2328_v14 = vpop.f32.mrf.mxu0 }
 0x548   : > { %v2332_v46 = vpack.c.bf16 %v2331_v13, %v2331_v13 }
 0x549   : > { %v3444_v17 = vpop.f32.mrf.mxu0 }
 0x54a   : > { %3462 = vmatmul.mubr.bf16.vlgmr.msra.gmra.mxu1 %v2332_v46 }
 0x54b   : > { %3501 = vmatprep.mubr.msk.bf16.mxu1 %vm3741_vm0, %v3740_v6  ;;  %3486 = vmatpush3.bf16.msra.mxu1 %v3712_v21 }
 0x54c   : > { %3487 = vmatprep.subr.bf16.mxu1 %v3740_v6 }
 0x54f   : > { %3488 = vmatpush3.bf16.msra.mxu1 %v3713_v22 }
 0x550   : > { %3489 = vmatprep.subr.bf16.mxu1 %v3740_v6 }
 0x553   : > { %3490 = vmatpush3.bf16.msra.mxu1 %v3714_v11 }
 0x554   : > { %3491 = vmatprep.subr.bf16.mxu1 %v3740_v6 }
 0x557   : > { %3492 = vmatpush3.bf16.msra.mxu1 %v3715_v23 }
 0x558   : > { %3493 = vmatprep.subr.bf16.mxu1 %v3740_v6 }
 0x55b   : > { %3494 = vmatpush3.bf16.msra.mxu1 %v3716_v24 }
 0x55c   : > { %3495 = vmatprep.subr.bf16.mxu1 %v3740_v6 }
 0x55f   : > { %3496 = vmatpush3.bf16.msra.mxu1 %v3717_v25 }
 0x560   : > { %3497 = vmatprep.subr.bf16.mxu1 %v3740_v6 }
 0x563   : > { %3498 = vmatpush3.bf16.msra.mxu1 %v3718_v30 }
 0x564   : > { %3499 = vmatprep.subr.bf16.mxu1 %v3740_v6 }
 0x567   : > { %3500 = vmatpush3.bf16.msra.mxu1 %v3719_v31 }
 0x60a   : > { %v2437_v16 = vpop.f32.mrf.mxu1 }
 0x60b   : > { %v2438_v27 = vadd.f32 %v3133_v15, %v2437_v16 }
 0x60c   : > { %v3463_v7 = vpop.f32.mrf.mxu1 }
 0x60d   : > { %v2443_v20 = vmax.f32 %v2438_v27, 0.0 }
 0x60e   : > { %v2440_v26 = vpop.f32.mrf.mxu1 }
 0x60f   : > { %v2444_v28 = vpack.c.bf16 %v2443_v20, %v2443_v20 }
 0x610   : > { %v3464_v29 = vpop.f32.mrf.mxu1 }
 0x611   : > { %3482 = vmatmul.mubr.bf16.vlgmr.msra.gmra.mxu0 %v2444_v28 }
 0x612   : > { %3521 = vmatprep.mubr.msk.bf16.mxu0 %vm3741_vm0, %v3740_v6  ;;  %3506 = vmatpush3.bf16.msra.mxu0 %v3720_v32 }
 0x613   : > { %3507 = vmatprep.subr.bf16.mxu0 %v3740_v6 }
 0x616   : > { %3508 = vmatpush3.bf16.msra.mxu0 %v3721_v57 }
 0x617   : > { %3509 = vmatprep.subr.bf16.mxu0 %v3740_v6 }
 0x61a   : > { %3510 = vmatpush3.bf16.msra.mxu0 %v3722_v33 }
 0x61b   : > { %3511 = vmatprep.subr.bf16.mxu0 %v3740_v6 }
 0x61e   : > { %3512 = vmatpush3.bf16.msra.mxu0 %v3723_v42 }
 0x61f   : > { %3513 = vmatprep.subr.bf16.mxu0 %v3740_v6 }
 0x622   : > { %3514 = vmatpush3.bf16.msra.mxu0 %v3724_v43 }
 0x623   : > { %3515 = vmatprep.subr.bf16.mxu0 %v3740_v6 }
 0x626   : > { %3516 = vmatpush3.bf16.msra.mxu0 %v3725_v44 }
 0x627   : > { %3517 = vmatprep.subr.bf16.mxu0 %v3740_v6 }
 0x62a   : > { %3518 = vmatpush3.bf16.msra.mxu0 %v3726_v45 }
 0x62b   : > { %3519 = vmatprep.subr.bf16.mxu0 %v3740_v6 }
 0x62e   : > { %3520 = vmatpush3.bf16.msra.mxu0 %v3727_v47 }
 0x6d1   : > { %v2549_v36 = vpop.f32.mrf.mxu0 }
 0x6d2   : > { %v2550_v37 = vadd.f32 %v3158_v34, %v2549_v36 }
 0x6d3   : > { %v3483_v38 = vpop.f32.mrf.mxu0 }
 0x6d4   : > { %v2555_v35 = vmax.f32 %v2550_v37, 0.0 }
 0x6d5   : > { %v2552_v39 = vpop.f32.mrf.mxu0 }
 0x6d6   : > { %v2556_v40 = vpack.c.bf16 %v2555_v35, %v2555_v35 }
 0x6d7   : > { %v3484_v41 = vpop.f32.mrf.mxu0 }
 0x6d8   : > { %3502 = vmatmul.mubr.bf16.vlgmr.msra.gmra.mxu1 %v2556_v40 }
 0x798   : > { %v2661_v48 = vpop.f32.mrf.mxu1 }
 0x799   : > { %v2662_v49 = vadd.f32 %v3183_v51, %v2661_v48 }
 0x79a   : > { %v3503_v50 = vpop.f32.mrf.mxu1 }
 0x79b   : > { %3728 = vtanh.f32 %v2662_v49 }
 0x79c   : > { %v2664_v52 = vpop.f32.mrf.mxu1 }
 0x79e   : > { %v3504_v53 = vpop.f32.mrf.mxu1 }
 0x7a8   : > { %v3729_v54 = vpop.eup %3728 }
 0x7a9   : > { %v2779_v55 = vmul.f32 %v3729_v54, %v3729_v54  ;;  %v2668_v56 = vpack.c.bf16 %v3729_v54, %v3729_v54 }
 0x7ab   : > { %2780 = vadd.xlane.f32.xlu1 %v2779_v55  ;;  %3522 = vmatmul.mubr.bf16.vlgmr.msra.gmra.mxu0 %v2668_v56 }
 0x834   : > { %v2781_v58 = vpop.xlane.xlu1 %2780 }
 0x835   : > { %v2782_v6 = vadd.f32 1e-12, %v2781_v58 }
 0x837   : > { %3730 = vrsqrt.f32 %v2782_v6 }
 0x844   : > { %v3731_v59 = vpop.eup %3730 }
 0x845   : > { %v2784_v60 = vmul.f32 %v3731_v59, %v3729_v54 }
 0x847   : > { %2785 = vst [vmem:[%s288_s22] sm:$0xff] %v2784_v60 }
 0x86b   : > { %v2773_v62 = vpop.f32.mrf.mxu0 }
 0x86c   : > { %v2774_v63 = vadd.f32 %v3208_v61, %v2773_v62 }
 0x86d   : > { %v3523_v0 = vpop.f32.mrf.mxu0 }
 0x86e   : > { %2786 = vst [vmem:[%s292_s30] sm:$0xff] %v2774_v63 }
 0x86f   : > { %v2776_v1 = vpop.f32.mrf.mxu0 }
 0x871   : > { %v3524_v2 = vpop.f32.mrf.mxu0 }
 0x872 PF: > { %s18_s24 = sadd.s32 1, %s3738_s24  }
 0x873   : > { %p15_p5 = scmp.ge.s32.totalorder %s18_s24, 4  }
 0x875   :  { %17 = sbr.rel (!%p15_p5) target bundleno = 1 (0x1), region = 92 }

</bundles_post_ra>
